<compile_context>
chip_gen: v6e
topology: v6e:2x2x1
jax: 0.10.0
libtpu: 0.0.40
codegen_flags: <defaults>
</compile_context>

<pallas_src>
import functools

import jax
import jax.numpy as jnp
import numpy as np
from jax import lax
from jax.experimental import pallas as pl
from jax.experimental.pallas import tpu as pltpu


def _round_up(x, m):
    return ((x + m - 1) // m) * m


# -----------------------------------------------------------------------------
# Fully fused encoder kernel (single invocation, in-kernel time loop).
# -----------------------------------------------------------------------------
def _encoder_fused_kernel(x_ref, wih_ref, whh_ref, bias_ref,
                          wf_ref, wr_ref, wres_ref, bo_ref,
                          whid_ref, wcell_ref, bhid_ref, bcell_ref,
                          out_ref, hid_ref, cel_ref,
                          gx_sc, hf_sc, hr_sc, h_sc, c_sc,
                          *, seq_len, bpad, hidden, residual):
    T, BP, H = seq_len, bpad, hidden
    BF = 2 * BP                      # fused (fwd+rev) batch rows

    # ---- prologue -----------------------------------------------------------
    h_sc[...] = jnp.zeros_like(h_sc)
    c_sc[...] = jnp.zeros_like(c_sc)

    # Hoisted input projection for ALL timesteps: one big lane/sublane-dense
    # matmul, bias folded in here so the serial loop never touches it.
    gx_sc[...] = (jnp.dot(x_ref[...], wih_ref[...],
                          preferred_element_type=jnp.float32)
                  + bias_ref[...])                              # (T*BP, 4H) f32

    whh = whh_ref[...]                                          # (H, 4H) bf16

    # ---- serial recurrence: only h @ Whh + gate math on the chain -----------
    def step(t, carry):
        off_f = pl.multiple_of(t * BP, BP)
        off_r = pl.multiple_of((T - 1 - t) * BP, BP)
        gx_f = gx_sc[pl.ds(off_f, BP), :]                       # (BP, 4H)  fwd x[t]
        gx_r = gx_sc[pl.ds(off_r, BP), :]                       # (BP, 4H)  rev x[T-1-t]
        gx = jnp.concatenate([gx_f, gx_r], axis=0)              # (2BP, 4H)

        h = h_sc[...]                                           # (2BP, H) f32
        c = c_sc[...]                                           # (2BP, H) f32

        gates = gx + jnp.dot(h.astype(whh.dtype), whh,
                             preferred_element_type=jnp.float32)  # (2BP, 4H)

        # Gate order is [i | f | o | g] (reordered on host): sigmoid over the
        # contiguous 3H slice, tanh only over the last H.
        sg = jax.nn.sigmoid(gates[:, 0:3 * H])
        i_g = sg[:, 0 * H:1 * H]
        f_g = sg[:, 1 * H:2 * H]
        o_g = sg[:, 2 * H:3 * H]
        g_g = jnp.tanh(gates[:, 3 * H:4 * H])

        c_new = f_g * c + i_g * g_g
        h_new = o_g * jnp.tanh(c_new)

        h_sc[...] = h_new
        c_sc[...] = c_new
        # History for the deferred output projection: rev rows are written at
        # the ORIGINAL time index so the epilogue needs no time reversal.
        hf_sc[pl.ds(off_f, BP), :] = h_new[0:BP]
        hr_sc[pl.ds(off_r, BP), :] = h_new[BP:BF]
        return carry

    lax.fori_loop(0, T, step, None, unroll=(T if T <= 16 else 4))

    # ---- epilogue: deferred output projection (bulk, lane-dense) ------------
    wf = wf_ref[...]                                            # (H, Do) bf16
    wr = wr_ref[...]                                            # (H, Do) bf16
    acc = (jnp.dot(hf_sc[...].astype(wf.dtype), wf,
                   preferred_element_type=jnp.float32)
           + jnp.dot(hr_sc[...].astype(wr.dtype), wr,
                     preferred_element_type=jnp.float32))       # (T*BP, Do)
    if residual:
        # (h_f + x) @ Wf + (h_r + x) @ Wr  ==  h_f@Wf + h_r@Wr + x@(Wf+Wr)
        acc = acc + jnp.dot(x_ref[...], wres_ref[...],
                            preferred_element_type=jnp.float32)
    out_ref[...] = acc + bo_ref[...]                            # single bulk store

    # ---- epilogue: hidden_nn / cell_nn on final states (two bf16 matmuls) ---
    whid = whid_ref[...]                                        # (2H, Dh) bf16
    wcell = wcell_ref[...]                                      # (2H, Dh) bf16
    h_fin = h_sc[...]
    c_fin = c_sc[...]
    h_cat = jnp.concatenate([h_fin[0:BP], h_fin[BP:BF]], axis=1).astype(whid.dtype)
    c_cat = jnp.concatenate([c_fin[0:BP], c_fin[BP:BF]], axis=1).astype(wcell.dtype)
    hid_ref[...] = (jnp.dot(h_cat, whid, preferred_element_type=jnp.float32)
                    + bhid_ref[...])
    cel_ref[...] = (jnp.dot(c_cat, wcell, preferred_element_type=jnp.float32)
                    + bcell_ref[...])


# -----------------------------------------------------------------------------
# Encoder forward (BiRecurrent over a 1-layer StackRNNCell, shared weights).
# -----------------------------------------------------------------------------
def encoder_forward(enc_input, params):
    emb_w = params["embedding"]
    B, T = enc_input.shape
    E = emb_w.shape[1]
    H = params["w_hh"].shape[1]
    Do = params["w_out"].shape[0]
    Dh = params["w_hid"].shape[0]

    # Pad per-direction batch so the fused state fills (8,128) vregs and all
    # dynamic sublane offsets inside the kernel are 8-aligned.
    BP = _round_up(B, 8)

    # TODO(synk): fold this gather into the kernel via scalar-prefetched ids.
    x_tbe = jnp.take(emb_w, enc_input.T, axis=0)                      # (T, B, E)
    x_tbe = jnp.pad(x_tbe, ((0, 0), (0, BP - B), (0, 0)))             # (T, BP, E)
    x2d = x_tbe.reshape(T * BP, E).astype(jnp.bfloat16)               # bf16 once

    # LSTM weights: gate columns reordered [i|f|g|o] -> [i|f|o|g], transposed,
    # bf16 for the MXU (f32 accumulate in-kernel).
    perm = np.concatenate([np.arange(0, 2 * H),
                           np.arange(3 * H, 4 * H),
                           np.arange(2 * H, 3 * H)])
    w_ih_t = params["w_ih"][perm].T.astype(jnp.bfloat16)              # (E, 4H)
    w_hh_t = params["w_hh"][perm].T.astype(jnp.bfloat16)              # (H, 4H)
    bias = (params["b_ih"] + params["b_hh"])[perm].reshape(1, 4 * H).astype(jnp.float32)

    # output_nn split into fwd / rev halves; residual folded into wres.
    w_out_t = params["w_out"].T.astype(jnp.float32)                   # (2H, Do)
    wf32, wr32 = w_out_t[:H], w_out_t[H:]
    residual = (E == H)                                               # StackRNNCell residual
    wres32 = (wf32 + wr32) if residual else jnp.zeros((E, Do), jnp.float32)
    wf = wf32.astype(jnp.bfloat16)
    wr = wr32.astype(jnp.bfloat16)
    wres = wres32.astype(jnp.bfloat16)
    b_out = params["b_out"].reshape(1, Do).astype(jnp.float32)

    w_hid_t = params["w_hid"].T.astype(jnp.bfloat16)                  # (2H, Dh)
    w_cell_t = params["w_cell"].T.astype(jnp.bfloat16)                # (2H, Dh)
    b_hid = params["b_hid"].reshape(1, Dh).astype(jnp.float32)
    b_cell = params["b_cell"].reshape(1, Dh).astype(jnp.float32)

    kernel = functools.partial(_encoder_fused_kernel, seq_len=T, bpad=BP,
                               hidden=H, residual=residual)

    out2d, hid, cel = pl.pallas_call(
        kernel,
        out_shape=(jax.ShapeDtypeStruct((T * BP, Do), jnp.float32),
                   jax.ShapeDtypeStruct((BP, Dh), jnp.float32),
                   jax.ShapeDtypeStruct((BP, Dh), jnp.float32)),
        scratch_shapes=[pltpu.VMEM((T * BP, 4 * H), jnp.float32),     # hoisted gates_x
                        pltpu.VMEM((T * BP, H), jnp.float32),         # fwd h history
                        pltpu.VMEM((T * BP, H), jnp.float32),         # rev h history (time-aligned)
                        pltpu.VMEM((2 * BP, H), jnp.float32),         # fused h state
                        pltpu.VMEM((2 * BP, H), jnp.float32)],        # fused c state
    )(x2d, w_ih_t, w_hh_t, bias, wf, wr, wres, b_out,
      w_hid_t, w_cell_t, b_hid, b_cell)

    output = out2d.reshape(T, BP, Do)[:, :B].transpose(1, 0, 2)       # (B, T, Do)
    return output, (hid[:B][None], cel[:B][None])


# -----------------------------------------------------------------------------
# Pure-JAX reference (mirrors the PyTorch forward) for validation.
# -----------------------------------------------------------------------------
def reference_encoder(enc_input, params):
    emb = params["embedding"][enc_input]
    B, T, E = emb.shape
    H = params["w_hh"].shape[1]

    def lstm_step(x, h, c):
        gates = (x @ params["w_ih"].T + params["b_ih"]
                 + h @ params["w_hh"].T + params["b_hh"])
        i, f, g, o = jnp.split(gates, 4, axis=-1)
        i = jax.nn.sigmoid(i); f = jax.nn.sigmoid(f)
        g = jnp.tanh(g); o = jax.nn.sigmoid(o)
        c2 = f * c + i * g
        h2 = o * jnp.tanh(c2)
        return h2, c2

    def run(reverse):
        h = jnp.zeros((B, H), jnp.float32)
        c = jnp.zeros((B, H), jnp.float32)
        outs = [None] * T
        order = range(T - 1, -1, -1) if reverse else range(T)
        for t in order:
            x = emb[:, t, :]
            h, c = lstm_step(x, h, c)
            outs[t] = h + x if E == H else h
        return jnp.stack(outs, axis=1), h, c

    f_seq, f_h, f_c = run(False)
    r_seq, r_h, r_c = run(True)
    out = jnp.concatenate([f_seq, r_seq], -1) @ params["w_out"].T + params["b_out"]
    hid = (jnp.concatenate([f_h, r_h], -1) @ params["w_hid"].T + params["b_hid"])[None]
    cel = (jnp.concatenate([f_c, r_c], -1) @ params["w_cell"].T + params["b_cell"])[None]
    return out, (hid, cel)


if __name__ == "__main__":
    # Small deterministic configuration.
    V, E, H = 20, 32, 32          # vocab, embedding_dim, rnn_dim
    B, T = 2, 8                   # batch, sequence length
    Do, Dh = 32, 32               # encoder_output_transformer, encoder_hidden_transformer
    pad_id = 0
    scale = 0.1

    key = jax.random.PRNGKey(0)
    ks = jax.random.split(key, 13)

    embedding = jax.random.normal(ks[0], (V, E), jnp.float32) * scale
    embedding = embedding.at[pad_id].set(0.0)   # padding_idx row is zero

    params = {
        "embedding": embedding,
        "w_ih": jax.random.normal(ks[1], (4 * H, E), jnp.float32) * scale,
        "w_hh": jax.random.normal(ks[2], (4 * H, H), jnp.float32) * scale,
        "b_ih": jax.random.normal(ks[3], (4 * H,), jnp.float32) * scale,
        "b_hh": jax.random.normal(ks[4], (4 * H,), jnp.float32) * scale,
        "w_out": jax.random.normal(ks[5], (Do, 2 * H), jnp.float32) * scale,
        "b_out": jax.random.normal(ks[6], (Do,), jnp.float32) * scale,
        "w_hid": jax.random.normal(ks[7], (Dh, 2 * H), jnp.float32) * scale,
        "b_hid": jax.random.normal(ks[8], (Dh,), jnp.float32) * scale,
        "w_cell": jax.random.normal(ks[9], (Dh, 2 * H), jnp.float32) * scale,
        "b_cell": jax.random.normal(ks[10], (Dh,), jnp.float32) * scale,
    }

    enc_input = jax.random.randint(ks[11], (B, T), 0, V, dtype=jnp.int32)

    output, (hidden, cell) = encoder_forward(enc_input, params)
    jax.block_until_ready((output, hidden, cell))

    ref_out, (ref_hid, ref_cell) = reference_encoder(enc_input, params)
    # bf16 MXU inputs in the kernel vs f32 reference -> slightly looser tolerance.
    np.testing.assert_allclose(np.asarray(output), np.asarray(ref_out),
                               rtol=2e-2, atol=2e-2)
    np.testing.assert_allclose(np.asarray(hidden), np.asarray(ref_hid),
                               rtol=2e-2, atol=2e-2)
    np.testing.assert_allclose(np.asarray(cell), np.asarray(ref_cell),
                               rtol=2e-2, atol=2e-2)

    assert output.shape == (B, T, Do)
    assert hidden.shape == (1, B, Dh)
    assert cell.shape == (1, B, Dh)

    print("KERNEL_OK")
</pallas_src>

<mosaic_0001>
module attributes {stable_mosaic.version = 11 : i64} {
  func.func @_encoder_fused_kernel(%arg0: memref<64x32xbf16, #tpu.memory_space<vmem>>, %arg1: memref<32x128xbf16, #tpu.memory_space<vmem>>, %arg2: memref<32x128xbf16, #tpu.memory_space<vmem>>, %arg3: memref<1x128xf32, #tpu.memory_space<vmem>>, %arg4: memref<32x32xbf16, #tpu.memory_space<vmem>>, %arg5: memref<32x32xbf16, #tpu.memory_space<vmem>>, %arg6: memref<32x32xbf16, #tpu.memory_space<vmem>>, %arg7: memref<1x32xf32, #tpu.memory_space<vmem>>, %arg8: memref<64x32xbf16, #tpu.memory_space<vmem>>, %arg9: memref<64x32xbf16, #tpu.memory_space<vmem>>, %arg10: memref<1x32xf32, #tpu.memory_space<vmem>>, %arg11: memref<1x32xf32, #tpu.memory_space<vmem>>, %arg12: memref<64x32xf32, #tpu.memory_space<vmem>>, %arg13: memref<8x32xf32, #tpu.memory_space<vmem>>, %arg14: memref<8x32xf32, #tpu.memory_space<vmem>>, %arg15: memref<64x128xf32, #tpu.memory_space<vmem>>, %arg16: memref<64x32xf32, #tpu.memory_space<vmem>>, %arg17: memref<64x32xf32, #tpu.memory_space<vmem>>, %arg18: memref<16x32xf32, #tpu.memory_space<vmem>>, %arg19: memref<16x32xf32, #tpu.memory_space<vmem>>) attributes {dimension_semantics = [], scalar_prefetch = 0 : i64, scratch_operands = 5 : i64, tpu.core_type = #tpu.core_type<tc>} {
    %cst = arith.constant 0.000000e+00 : f32
    %0 = vector.broadcast %cst : f32 to vector<16x32xf32>
    %c0 = arith.constant 0 : index
    %c0_0 = arith.constant 0 : index
    %1 = vector.load %arg18[%c0, %c0_0] : memref<16x32xf32, #tpu.memory_space<vmem>>, vector<16x32xf32>
    tpu.vector_store %arg18[%c0, %c0_0], %0 {strides = array<i32>} : memref<16x32xf32, #tpu.memory_space<vmem>>, vector<16x32xf32>,
    %cst_1 = arith.constant 0.000000e+00 : f32
    %2 = vector.broadcast %cst_1 : f32 to vector<16x32xf32>
    %c0_2 = arith.constant 0 : index
    %c0_3 = arith.constant 0 : index
    %3 = vector.load %arg19[%c0_2, %c0_3] : memref<16x32xf32, #tpu.memory_space<vmem>>, vector<16x32xf32>
    tpu.vector_store %arg19[%c0_2, %c0_3], %2 {strides = array<i32>} : memref<16x32xf32, #tpu.memory_space<vmem>>, vector<16x32xf32>,
    %c0_4 = arith.constant 0 : index
    %c0_5 = arith.constant 0 : index
    %4 = vector.load %arg0[%c0_4, %c0_5] : memref<64x32xbf16, #tpu.memory_space<vmem>>, vector<64x32xbf16>
    %c0_6 = arith.constant 0 : index
    %c0_7 = arith.constant 0 : index
    %5 = vector.load %arg1[%c0_6, %c0_7] : memref<32x128xbf16, #tpu.memory_space<vmem>>, vector<32x128xbf16>
    %cst_8 = arith.constant dense<0.000000e+00> : vector<64x128xf32>
    %6 = tpu.matmul %4, %5, %cst_8 {dimension_numbers = #tpu.dot_dimension_numbers<[1], [0], [0], [1], [0, 0, 1, 1], [], []>} : vector<64x32xbf16>, vector<32x128xbf16>, vector<64x128xf32> -> vector<64x128xf32>
    %c0_9 = arith.constant 0 : index
    %c0_10 = arith.constant 0 : index
    %7 = vector.load %arg3[%c0_9, %c0_10] : memref<1x128xf32, #tpu.memory_space<vmem>>, vector<1x128xf32>
    %8 = vector.broadcast %7 : vector<1x128xf32> to vector<64x128xf32>
    %9 = arith.addf %6, %8 : vector<64x128xf32>
    %c0_11 = arith.constant 0 : index
    %c0_12 = arith.constant 0 : index
    %10 = vector.load %arg15[%c0_11, %c0_12] : memref<64x128xf32, #tpu.memory_space<vmem>>, vector<64x128xf32>
    tpu.vector_store %arg15[%c0_11, %c0_12], %9 {strides = array<i32>} : memref<64x128xf32, #tpu.memory_space<vmem>>, vector<64x128xf32>,
    %c0_13 = arith.constant 0 : index
    %c0_14 = arith.constant 0 : index
    %11 = vector.load %arg2[%c0_13, %c0_14] : memref<32x128xbf16, #tpu.memory_space<vmem>>, vector<32x128xbf16>
    %c0_i32 = arith.constant 0 : i32
    %c8_i32 = arith.constant 8 : i32
    %12 = arith.muli %c0_i32, %c8_i32 : i32
    %13 = tpu.assume_multiple %12, 8 : i32
    %c7_i32 = arith.constant 7 : i32
    %14 = arith.subi %c7_i32, %c0_i32 : i32
    %c8_i32_15 = arith.constant 8 : i32
    %15 = arith.muli %14, %c8_i32_15 : i32
    %16 = tpu.assume_multiple %15, 8 : i32
    %17 = arith.index_cast %13 : i32 to index
    %c0_16 = arith.constant 0 : index
    %18 = vector.load %arg15[%17, %c0_16] : memref<64x128xf32, #tpu.memory_space<vmem>>, vector<8x128xf32>
    %19 = arith.index_cast %16 : i32 to index
    %c0_17 = arith.constant 0 : index
    %20 = vector.load %arg15[%19, %c0_17] : memref<64x128xf32, #tpu.memory_space<vmem>>, vector<8x128xf32>
    %21 = tpu.concatenate %18, %20 in 0 : vector<8x128xf32>, vector<8x128xf32> -> vector<16x128xf32>
    %c0_18 = arith.constant 0 : index
    %c0_19 = arith.constant 0 : index
    %22 = vector.load %arg18[%c0_18, %c0_19] : memref<16x32xf32, #tpu.memory_space<vmem>>, vector<16x32xf32>
    %c0_20 = arith.constant 0 : index
    %c0_21 = arith.constant 0 : index
    %23 = vector.load %arg19[%c0_20, %c0_21] : memref<16x32xf32, #tpu.memory_space<vmem>>, vector<16x32xf32>
    %24 = arith.truncf %22 : vector<16x32xf32> to vector<16x32xbf16>
    %cst_22 = arith.constant dense<0.000000e+00> : vector<16x128xf32>
    %25 = tpu.matmul %24, %11, %cst_22 {dimension_numbers = #tpu.dot_dimension_numbers<[1], [0], [0], [1], [0, 0, 1, 1], [], []>} : vector<16x32xbf16>, vector<32x128xbf16>, vector<16x128xf32> -> vector<16x128xf32>
    %26 = arith.addf %21, %25 : vector<16x128xf32>
    %27 = vector.extract_strided_slice %26 {offsets = [0, 0], sizes = [16, 96], strides = [1, 1]} : vector<16x128xf32> to vector<16x96xf32>
    %28 = arith.negf %27 : vector<16x96xf32>
    %29 = math.exp %28 : vector<16x96xf32>
    %cst_23 = arith.constant 1.000000e+00 : f32
    %30 = vector.broadcast %cst_23 : f32 to vector<16x96xf32>
    %31 = arith.addf %30, %29 : vector<16x96xf32>
    %32 = arith.divf %30, %31 : vector<16x96xf32>
    %33 = vector.extract_strided_slice %32 {offsets = [0, 0], sizes = [16, 32], strides = [1, 1]} : vector<16x96xf32> to vector<16x32xf32>
    %34 = vector.extract_strided_slice %32 {offsets = [0, 32], sizes = [16, 32], strides = [1, 1]} : vector<16x96xf32> to vector<16x32xf32>
    %35 = vector.extract_strided_slice %32 {offsets = [0, 64], sizes = [16, 32], strides = [1, 1]} : vector<16x96xf32> to vector<16x32xf32>
    %36 = vector.extract_strided_slice %26 {offsets = [0, 96], sizes = [16, 32], strides = [1, 1]} : vector<16x128xf32> to vector<16x32xf32>
    %37 = math.tanh %36 : vector<16x32xf32>
    %38 = arith.mulf %34, %23 : vector<16x32xf32>
    %39 = arith.mulf %33, %37 : vector<16x32xf32>
    %40 = arith.addf %38, %39 : vector<16x32xf32>
    %41 = math.tanh %40 : vector<16x32xf32>
    %42 = arith.mulf %35, %41 : vector<16x32xf32>
    %c0_24 = arith.constant 0 : index
    %c0_25 = arith.constant 0 : index
    %43 = vector.load %arg18[%c0_24, %c0_25] : memref<16x32xf32, #tpu.memory_space<vmem>>, vector<16x32xf32>
    tpu.vector_store %arg18[%c0_24, %c0_25], %42 {strides = array<i32>} : memref<16x32xf32, #tpu.memory_space<vmem>>, vector<16x32xf32>,
    %c0_26 = arith.constant 0 : index
    %c0_27 = arith.constant 0 : index
    %44 = vector.load %arg19[%c0_26, %c0_27] : memref<16x32xf32, #tpu.memory_space<vmem>>, vector<16x32xf32>
    tpu.vector_store %arg19[%c0_26, %c0_27], %40 {strides = array<i32>} : memref<16x32xf32, #tpu.memory_space<vmem>>, vector<16x32xf32>,
    %45 = vector.extract_strided_slice %42 {offsets = [0, 0], sizes = [8, 32], strides = [1, 1]} : vector<16x32xf32> to vector<8x32xf32>
    %46 = arith.index_cast %13 : i32 to index
    %c0_28 = arith.constant 0 : index
    %47 = vector.load %arg16[%46, %c0_28] : memref<64x32xf32, #tpu.memory_space<vmem>>, vector<8x32xf32>
    tpu.vector_store %arg16[%46, %c0_28], %45 {strides = array<i32>} : memref<64x32xf32, #tpu.memory_space<vmem>>, vector<8x32xf32>,
    %48 = vector.extract_strided_slice %42 {offsets = [8, 0], sizes = [8, 32], strides = [1, 1]} : vector<16x32xf32> to vector<8x32xf32>
    %49 = arith.index_cast %16 : i32 to index
    %c0_29 = arith.constant 0 : index
    %50 = vector.load %arg17[%49, %c0_29] : memref<64x32xf32, #tpu.memory_space<vmem>>, vector<8x32xf32>
    tpu.vector_store %arg17[%49, %c0_29], %48 {strides = array<i32>} : memref<64x32xf32, #tpu.memory_space<vmem>>, vector<8x32xf32>,
    %c1_i32 = arith.constant 1 : i32
    %c8_i32_30 = arith.constant 8 : i32
    %51 = arith.muli %c1_i32, %c8_i32_30 : i32
    %52 = tpu.assume_multiple %51, 8 : i32
    %c7_i32_31 = arith.constant 7 : i32
    %53 = arith.subi %c7_i32_31, %c1_i32 : i32
    %c8_i32_32 = arith.constant 8 : i32
    %54 = arith.muli %53, %c8_i32_32 : i32
    %55 = tpu.assume_multiple %54, 8 : i32
    %56 = arith.index_cast %52 : i32 to index
    %c0_33 = arith.constant 0 : index
    %57 = vector.load %arg15[%56, %c0_33] : memref<64x128xf32, #tpu.memory_space<vmem>>, vector<8x128xf32>
    %58 = arith.index_cast %55 : i32 to index
    %c0_34 = arith.constant 0 : index
    %59 = vector.load %arg15[%58, %c0_34] : memref<64x128xf32, #tpu.memory_space<vmem>>, vector<8x128xf32>
    %60 = tpu.concatenate %57, %59 in 0 : vector<8x128xf32>, vector<8x128xf32> -> vector<16x128xf32>
    %c0_35 = arith.constant 0 : index
    %c0_36 = arith.constant 0 : index
    %61 = vector.load %arg18[%c0_35, %c0_36] : memref<16x32xf32, #tpu.memory_space<vmem>>, vector<16x32xf32>
    %c0_37 = arith.constant 0 : index
    %c0_38 = arith.constant 0 : index
    %62 = vector.load %arg19[%c0_37, %c0_38] : memref<16x32xf32, #tpu.memory_space<vmem>>, vector<16x32xf32>
    %63 = arith.truncf %61 : vector<16x32xf32> to vector<16x32xbf16>
    %cst_39 = arith.constant dense<0.000000e+00> : vector<16x128xf32>
    %64 = tpu.matmul %63, %11, %cst_39 {dimension_numbers = #tpu.dot_dimension_numbers<[1], [0], [0], [1], [0, 0, 1, 1], [], []>} : vector<16x32xbf16>, vector<32x128xbf16>, vector<16x128xf32> -> vector<16x128xf32>
    %65 = arith.addf %60, %64 : vector<16x128xf32>
    %66 = vector.extract_strided_slice %65 {offsets = [0, 0], sizes = [16, 96], strides = [1, 1]} : vector<16x128xf32> to vector<16x96xf32>
    %67 = arith.negf %66 : vector<16x96xf32>
    %68 = math.exp %67 : vector<16x96xf32>
    %cst_40 = arith.constant 1.000000e+00 : f32
    %69 = vector.broadcast %cst_40 : f32 to vector<16x96xf32>
    %70 = arith.addf %69, %68 : vector<16x96xf32>
    %71 = arith.divf %69, %70 : vector<16x96xf32>
    %72 = vector.extract_strided_slice %71 {offsets = [0, 0], sizes = [16, 32], strides = [1, 1]} : vector<16x96xf32> to vector<16x32xf32>
    %73 = vector.extract_strided_slice %71 {offsets = [0, 32], sizes = [16, 32], strides = [1, 1]} : vector<16x96xf32> to vector<16x32xf32>
    %74 = vector.extract_strided_slice %71 {offsets = [0, 64], sizes = [16, 32], strides = [1, 1]} : vector<16x96xf32> to vector<16x32xf32>
    %75 = vector.extract_strided_slice %65 {offsets = [0, 96], sizes = [16, 32], strides = [1, 1]} : vector<16x128xf32> to vector<16x32xf32>
    %76 = math.tanh %75 : vector<16x32xf32>
    %77 = arith.mulf %73, %62 : vector<16x32xf32>
    %78 = arith.mulf %72, %76 : vector<16x32xf32>
    %79 = arith.addf %77, %78 : vector<16x32xf32>
    %80 = math.tanh %79 : vector<16x32xf32>
    %81 = arith.mulf %74, %80 : vector<16x32xf32>
    %c0_41 = arith.constant 0 : index
    %c0_42 = arith.constant 0 : index
    %82 = vector.load %arg18[%c0_41, %c0_42] : memref<16x32xf32, #tpu.memory_space<vmem>>, vector<16x32xf32>
    tpu.vector_store %arg18[%c0_41, %c0_42], %81 {strides = array<i32>} : memref<16x32xf32, #tpu.memory_space<vmem>>, vector<16x32xf32>,
    %c0_43 = arith.constant 0 : index
    %c0_44 = arith.constant 0 : index
    %83 = vector.load %arg19[%c0_43, %c0_44] : memref<16x32xf32, #tpu.memory_space<vmem>>, vector<16x32xf32>
    tpu.vector_store %arg19[%c0_43, %c0_44], %79 {strides = array<i32>} : memref<16x32xf32, #tpu.memory_space<vmem>>, vector<16x32xf32>,
    %84 = vector.extract_strided_slice %81 {offsets = [0, 0], sizes = [8, 32], strides = [1, 1]} : vector<16x32xf32> to vector<8x32xf32>
    %85 = arith.index_cast %52 : i32 to index
    %c0_45 = arith.constant 0 : index
    %86 = vector.load %arg16[%85, %c0_45] : memref<64x32xf32, #tpu.memory_space<vmem>>, vector<8x32xf32>
    tpu.vector_store %arg16[%85, %c0_45], %84 {strides = array<i32>} : memref<64x32xf32, #tpu.memory_space<vmem>>, vector<8x32xf32>,
    %87 = vector.extract_strided_slice %81 {offsets = [8, 0], sizes = [8, 32], strides = [1, 1]} : vector<16x32xf32> to vector<8x32xf32>
    %88 = arith.index_cast %55 : i32 to index
    %c0_46 = arith.constant 0 : index
    %89 = vector.load %arg17[%88, %c0_46] : memref<64x32xf32, #tpu.memory_space<vmem>>, vector<8x32xf32>
    tpu.vector_store %arg17[%88, %c0_46], %87 {strides = array<i32>} : memref<64x32xf32, #tpu.memory_space<vmem>>, vector<8x32xf32>,
    %c2_i32 = arith.constant 2 : i32
    %c8_i32_47 = arith.constant 8 : i32
    %90 = arith.muli %c2_i32, %c8_i32_47 : i32
    %91 = tpu.assume_multiple %90, 8 : i32
    %c7_i32_48 = arith.constant 7 : i32
    %92 = arith.subi %c7_i32_48, %c2_i32 : i32
    %c8_i32_49 = arith.constant 8 : i32
    %93 = arith.muli %92, %c8_i32_49 : i32
    %94 = tpu.assume_multiple %93, 8 : i32
    %95 = arith.index_cast %91 : i32 to index
    %c0_50 = arith.constant 0 : index
    %96 = vector.load %arg15[%95, %c0_50] : memref<64x128xf32, #tpu.memory_space<vmem>>, vector<8x128xf32>
    %97 = arith.index_cast %94 : i32 to index
    %c0_51 = arith.constant 0 : index
    %98 = vector.load %arg15[%97, %c0_51] : memref<64x128xf32, #tpu.memory_space<vmem>>, vector<8x128xf32>
    %99 = tpu.concatenate %96, %98 in 0 : vector<8x128xf32>, vector<8x128xf32> -> vector<16x128xf32>
    %c0_52 = arith.constant 0 : index
    %c0_53 = arith.constant 0 : index
    %100 = vector.load %arg18[%c0_52, %c0_53] : memref<16x32xf32, #tpu.memory_space<vmem>>, vector<16x32xf32>
    %c0_54 = arith.constant 0 : index
    %c0_55 = arith.constant 0 : index
    %101 = vector.load %arg19[%c0_54, %c0_55] : memref<16x32xf32, #tpu.memory_space<vmem>>, vector<16x32xf32>
    %102 = arith.truncf %100 : vector<16x32xf32> to vector<16x32xbf16>
    %cst_56 = arith.constant dense<0.000000e+00> : vector<16x128xf32>
    %103 = tpu.matmul %102, %11, %cst_56 {dimension_numbers = #tpu.dot_dimension_numbers<[1], [0], [0], [1], [0, 0, 1, 1], [], []>} : vector<16x32xbf16>, vector<32x128xbf16>, vector<16x128xf32> -> vector<16x128xf32>
    %104 = arith.addf %99, %103 : vector<16x128xf32>
    %105 = vector.extract_strided_slice %104 {offsets = [0, 0], sizes = [16, 96], strides = [1, 1]} : vector<16x128xf32> to vector<16x96xf32>
    %106 = arith.negf %105 : vector<16x96xf32>
    %107 = math.exp %106 : vector<16x96xf32>
    %cst_57 = arith.constant 1.000000e+00 : f32
    %108 = vector.broadcast %cst_57 : f32 to vector<16x96xf32>
    %109 = arith.addf %108, %107 : vector<16x96xf32>
    %110 = arith.divf %108, %109 : vector<16x96xf32>
    %111 = vector.extract_strided_slice %110 {offsets = [0, 0], sizes = [16, 32], strides = [1, 1]} : vector<16x96xf32> to vector<16x32xf32>
    %112 = vector.extract_strided_slice %110 {offsets = [0, 32], sizes = [16, 32], strides = [1, 1]} : vector<16x96xf32> to vector<16x32xf32>
    %113 = vector.extract_strided_slice %110 {offsets = [0, 64], sizes = [16, 32], strides = [1, 1]} : vector<16x96xf32> to vector<16x32xf32>
    %114 = vector.extract_strided_slice %104 {offsets = [0, 96], sizes = [16, 32], strides = [1, 1]} : vector<16x128xf32> to vector<16x32xf32>
    %115 = math.tanh %114 : vector<16x32xf32>
    %116 = arith.mulf %112, %101 : vector<16x32xf32>
    %117 = arith.mulf %111, %115 : vector<16x32xf32>
    %118 = arith.addf %116, %117 : vector<16x32xf32>
    %119 = math.tanh %118 : vector<16x32xf32>
    %120 = arith.mulf %113, %119 : vector<16x32xf32>
    %c0_58 = arith.constant 0 : index
    %c0_59 = arith.constant 0 : index
    %121 = vector.load %arg18[%c0_58, %c0_59] : memref<16x32xf32, #tpu.memory_space<vmem>>, vector<16x32xf32>
    tpu.vector_store %arg18[%c0_58, %c0_59], %120 {strides = array<i32>} : memref<16x32xf32, #tpu.memory_space<vmem>>, vector<16x32xf32>,
    %c0_60 = arith.constant 0 : index
    %c0_61 = arith.constant 0 : index
    %122 = vector.load %arg19[%c0_60, %c0_61] : memref<16x32xf32, #tpu.memory_space<vmem>>, vector<16x32xf32>
    tpu.vector_store %arg19[%c0_60, %c0_61], %118 {strides = array<i32>} : memref<16x32xf32, #tpu.memory_space<vmem>>, vector<16x32xf32>,
    %123 = vector.extract_strided_slice %120 {offsets = [0, 0], sizes = [8, 32], strides = [1, 1]} : vector<16x32xf32> to vector<8x32xf32>
    %124 = arith.index_cast %91 : i32 to index
    %c0_62 = arith.constant 0 : index
    %125 = vector.load %arg16[%124, %c0_62] : memref<64x32xf32, #tpu.memory_space<vmem>>, vector<8x32xf32>
    tpu.vector_store %arg16[%124, %c0_62], %123 {strides = array<i32>} : memref<64x32xf32, #tpu.memory_space<vmem>>, vector<8x32xf32>,
    %126 = vector.extract_strided_slice %120 {offsets = [8, 0], sizes = [8, 32], strides = [1, 1]} : vector<16x32xf32> to vector<8x32xf32>
    %127 = arith.index_cast %94 : i32 to index
    %c0_63 = arith.constant 0 : index
    %128 = vector.load %arg17[%127, %c0_63] : memref<64x32xf32, #tpu.memory_space<vmem>>, vector<8x32xf32>
    tpu.vector_store %arg17[%127, %c0_63], %126 {strides = array<i32>} : memref<64x32xf32, #tpu.memory_space<vmem>>, vector<8x32xf32>,
    %c3_i32 = arith.constant 3 : i32
    %c8_i32_64 = arith.constant 8 : i32
    %129 = arith.muli %c3_i32, %c8_i32_64 : i32
    %130 = tpu.assume_multiple %129, 8 : i32
    %c7_i32_65 = arith.constant 7 : i32
    %131 = arith.subi %c7_i32_65, %c3_i32 : i32
    %c8_i32_66 = arith.constant 8 : i32
    %132 = arith.muli %131, %c8_i32_66 : i32
    %133 = tpu.assume_multiple %132, 8 : i32
    %134 = arith.index_cast %130 : i32 to index
    %c0_67 = arith.constant 0 : index
    %135 = vector.load %arg15[%134, %c0_67] : memref<64x128xf32, #tpu.memory_space<vmem>>, vector<8x128xf32>
    %136 = arith.index_cast %133 : i32 to index
    %c0_68 = arith.constant 0 : index
    %137 = vector.load %arg15[%136, %c0_68] : memref<64x128xf32, #tpu.memory_space<vmem>>, vector<8x128xf32>
    %138 = tpu.concatenate %135, %137 in 0 : vector<8x128xf32>, vector<8x128xf32> -> vector<16x128xf32>
    %c0_69 = arith.constant 0 : index
    %c0_70 = arith.constant 0 : index
    %139 = vector.load %arg18[%c0_69, %c0_70] : memref<16x32xf32, #tpu.memory_space<vmem>>, vector<16x32xf32>
    %c0_71 = arith.constant 0 : index
    %c0_72 = arith.constant 0 : index
    %140 = vector.load %arg19[%c0_71, %c0_72] : memref<16x32xf32, #tpu.memory_space<vmem>>, vector<16x32xf32>
    %141 = arith.truncf %139 : vector<16x32xf32> to vector<16x32xbf16>
    %cst_73 = arith.constant dense<0.000000e+00> : vector<16x128xf32>
    %142 = tpu.matmul %141, %11, %cst_73 {dimension_numbers = #tpu.dot_dimension_numbers<[1], [0], [0], [1], [0, 0, 1, 1], [], []>} : vector<16x32xbf16>, vector<32x128xbf16>, vector<16x128xf32> -> vector<16x128xf32>
    %143 = arith.addf %138, %142 : vector<16x128xf32>
    %144 = vector.extract_strided_slice %143 {offsets = [0, 0], sizes = [16, 96], strides = [1, 1]} : vector<16x128xf32> to vector<16x96xf32>
    %145 = arith.negf %144 : vector<16x96xf32>
    %146 = math.exp %145 : vector<16x96xf32>
    %cst_74 = arith.constant 1.000000e+00 : f32
    %147 = vector.broadcast %cst_74 : f32 to vector<16x96xf32>
    %148 = arith.addf %147, %146 : vector<16x96xf32>
    %149 = arith.divf %147, %148 : vector<16x96xf32>
    %150 = vector.extract_strided_slice %149 {offsets = [0, 0], sizes = [16, 32], strides = [1, 1]} : vector<16x96xf32> to vector<16x32xf32>
    %151 = vector.extract_strided_slice %149 {offsets = [0, 32], sizes = [16, 32], strides = [1, 1]} : vector<16x96xf32> to vector<16x32xf32>
    %152 = vector.extract_strided_slice %149 {offsets = [0, 64], sizes = [16, 32], strides = [1, 1]} : vector<16x96xf32> to vector<16x32xf32>
    %153 = vector.extract_strided_slice %143 {offsets = [0, 96], sizes = [16, 32], strides = [1, 1]} : vector<16x128xf32> to vector<16x32xf32>
    %154 = math.tanh %153 : vector<16x32xf32>
    %155 = arith.mulf %151, %140 : vector<16x32xf32>
    %156 = arith.mulf %150, %154 : vector<16x32xf32>
    %157 = arith.addf %155, %156 : vector<16x32xf32>
    %158 = math.tanh %157 : vector<16x32xf32>
    %159 = arith.mulf %152, %158 : vector<16x32xf32>
    %c0_75 = arith.constant 0 : index
    %c0_76 = arith.constant 0 : index
    %160 = vector.load %arg18[%c0_75, %c0_76] : memref<16x32xf32, #tpu.memory_space<vmem>>, vector<16x32xf32>
    tpu.vector_store %arg18[%c0_75, %c0_76], %159 {strides = array<i32>} : memref<16x32xf32, #tpu.memory_space<vmem>>, vector<16x32xf32>,
    %c0_77 = arith.constant 0 : index
    %c0_78 = arith.constant 0 : index
    %161 = vector.load %arg19[%c0_77, %c0_78] : memref<16x32xf32, #tpu.memory_space<vmem>>, vector<16x32xf32>
    tpu.vector_store %arg19[%c0_77, %c0_78], %157 {strides = array<i32>} : memref<16x32xf32, #tpu.memory_space<vmem>>, vector<16x32xf32>,
    %162 = vector.extract_strided_slice %159 {offsets = [0, 0], sizes = [8, 32], strides = [1, 1]} : vector<16x32xf32> to vector<8x32xf32>
    %163 = arith.index_cast %130 : i32 to index
    %c0_79 = arith.constant 0 : index
    %164 = vector.load %arg16[%163, %c0_79] : memref<64x32xf32, #tpu.memory_space<vmem>>, vector<8x32xf32>
    tpu.vector_store %arg16[%163, %c0_79], %162 {strides = array<i32>} : memref<64x32xf32, #tpu.memory_space<vmem>>, vector<8x32xf32>,
    %165 = vector.extract_strided_slice %159 {offsets = [8, 0], sizes = [8, 32], strides = [1, 1]} : vector<16x32xf32> to vector<8x32xf32>
    %166 = arith.index_cast %133 : i32 to index
    %c0_80 = arith.constant 0 : index
    %167 = vector.load %arg17[%166, %c0_80] : memref<64x32xf32, #tpu.memory_space<vmem>>, vector<8x32xf32>
    tpu.vector_store %arg17[%166, %c0_80], %165 {strides = array<i32>} : memref<64x32xf32, #tpu.memory_space<vmem>>, vector<8x32xf32>,
    %c4_i32 = arith.constant 4 : i32
    %c8_i32_81 = arith.constant 8 : i32
    %168 = arith.muli %c4_i32, %c8_i32_81 : i32
    %169 = tpu.assume_multiple %168, 8 : i32
    %c7_i32_82 = arith.constant 7 : i32
    %170 = arith.subi %c7_i32_82, %c4_i32 : i32
    %c8_i32_83 = arith.constant 8 : i32
    %171 = arith.muli %170, %c8_i32_83 : i32
    %172 = tpu.assume_multiple %171, 8 : i32
    %173 = arith.index_cast %169 : i32 to index
    %c0_84 = arith.constant 0 : index
    %174 = vector.load %arg15[%173, %c0_84] : memref<64x128xf32, #tpu.memory_space<vmem>>, vector<8x128xf32>
    %175 = arith.index_cast %172 : i32 to index
    %c0_85 = arith.constant 0 : index
    %176 = vector.load %arg15[%175, %c0_85] : memref<64x128xf32, #tpu.memory_space<vmem>>, vector<8x128xf32>
    %177 = tpu.concatenate %174, %176 in 0 : vector<8x128xf32>, vector<8x128xf32> -> vector<16x128xf32>
    %c0_86 = arith.constant 0 : index
    %c0_87 = arith.constant 0 : index
    %178 = vector.load %arg18[%c0_86, %c0_87] : memref<16x32xf32, #tpu.memory_space<vmem>>, vector<16x32xf32>
    %c0_88 = arith.constant 0 : index
    %c0_89 = arith.constant 0 : index
    %179 = vector.load %arg19[%c0_88, %c0_89] : memref<16x32xf32, #tpu.memory_space<vmem>>, vector<16x32xf32>
    %180 = arith.truncf %178 : vector<16x32xf32> to vector<16x32xbf16>
    %cst_90 = arith.constant dense<0.000000e+00> : vector<16x128xf32>
    %181 = tpu.matmul %180, %11, %cst_90 {dimension_numbers = #tpu.dot_dimension_numbers<[1], [0], [0], [1], [0, 0, 1, 1], [], []>} : vector<16x32xbf16>, vector<32x128xbf16>, vector<16x128xf32> -> vector<16x128xf32>
    %182 = arith.addf %177, %181 : vector<16x128xf32>
    %183 = vector.extract_strided_slice %182 {offsets = [0, 0], sizes = [16, 96], strides = [1, 1]} : vector<16x128xf32> to vector<16x96xf32>
    %184 = arith.negf %183 : vector<16x96xf32>
    %185 = math.exp %184 : vector<16x96xf32>
    %cst_91 = arith.constant 1.000000e+00 : f32
    %186 = vector.broadcast %cst_91 : f32 to vector<16x96xf32>
    %187 = arith.addf %186, %185 : vector<16x96xf32>
    %188 = arith.divf %186, %187 : vector<16x96xf32>
    %189 = vector.extract_strided_slice %188 {offsets = [0, 0], sizes = [16, 32], strides = [1, 1]} : vector<16x96xf32> to vector<16x32xf32>
    %190 = vector.extract_strided_slice %188 {offsets = [0, 32], sizes = [16, 32], strides = [1, 1]} : vector<16x96xf32> to vector<16x32xf32>
    %191 = vector.extract_strided_slice %188 {offsets = [0, 64], sizes = [16, 32], strides = [1, 1]} : vector<16x96xf32> to vector<16x32xf32>
    %192 = vector.extract_strided_slice %182 {offsets = [0, 96], sizes = [16, 32], strides = [1, 1]} : vector<16x128xf32> to vector<16x32xf32>
    %193 = math.tanh %192 : vector<16x32xf32>
    %194 = arith.mulf %190, %179 : vector<16x32xf32>
    %195 = arith.mulf %189, %193 : vector<16x32xf32>
    %196 = arith.addf %194, %195 : vector<16x32xf32>
    %197 = math.tanh %196 : vector<16x32xf32>
    %198 = arith.mulf %191, %197 : vector<16x32xf32>
    %c0_92 = arith.constant 0 : index
    %c0_93 = arith.constant 0 : index
    %199 = vector.load %arg18[%c0_92, %c0_93] : memref<16x32xf32, #tpu.memory_space<vmem>>, vector<16x32xf32>
    tpu.vector_store %arg18[%c0_92, %c0_93], %198 {strides = array<i32>} : memref<16x32xf32, #tpu.memory_space<vmem>>, vector<16x32xf32>,
    %c0_94 = arith.constant 0 : index
    %c0_95 = arith.constant 0 : index
    %200 = vector.load %arg19[%c0_94, %c0_95] : memref<16x32xf32, #tpu.memory_space<vmem>>, vector<16x32xf32>
    tpu.vector_store %arg19[%c0_94, %c0_95], %196 {strides = array<i32>} : memref<16x32xf32, #tpu.memory_space<vmem>>, vector<16x32xf32>,
    %201 = vector.extract_strided_slice %198 {offsets = [0, 0], sizes = [8, 32], strides = [1, 1]} : vector<16x32xf32> to vector<8x32xf32>
    %202 = arith.index_cast %169 : i32 to index
    %c0_96 = arith.constant 0 : index
    %203 = vector.load %arg16[%202, %c0_96] : memref<64x32xf32, #tpu.memory_space<vmem>>, vector<8x32xf32>
    tpu.vector_store %arg16[%202, %c0_96], %201 {strides = array<i32>} : memref<64x32xf32, #tpu.memory_space<vmem>>, vector<8x32xf32>,
    %204 = vector.extract_strided_slice %198 {offsets = [8, 0], sizes = [8, 32], strides = [1, 1]} : vector<16x32xf32> to vector<8x32xf32>
    %205 = arith.index_cast %172 : i32 to index
    %c0_97 = arith.constant 0 : index
    %206 = vector.load %arg17[%205, %c0_97] : memref<64x32xf32, #tpu.memory_space<vmem>>, vector<8x32xf32>
    tpu.vector_store %arg17[%205, %c0_97], %204 {strides = array<i32>} : memref<64x32xf32, #tpu.memory_space<vmem>>, vector<8x32xf32>,
    %c5_i32 = arith.constant 5 : i32
    %c8_i32_98 = arith.constant 8 : i32
    %207 = arith.muli %c5_i32, %c8_i32_98 : i32
    %208 = tpu.assume_multiple %207, 8 : i32
    %c7_i32_99 = arith.constant 7 : i32
    %209 = arith.subi %c7_i32_99, %c5_i32 : i32
    %c8_i32_100 = arith.constant 8 : i32
    %210 = arith.muli %209, %c8_i32_100 : i32
    %211 = tpu.assume_multiple %210, 8 : i32
    %212 = arith.index_cast %208 : i32 to index
    %c0_101 = arith.constant 0 : index
    %213 = vector.load %arg15[%212, %c0_101] : memref<64x128xf32, #tpu.memory_space<vmem>>, vector<8x128xf32>
    %214 = arith.index_cast %211 : i32 to index
    %c0_102 = arith.constant 0 : index
    %215 = vector.load %arg15[%214, %c0_102] : memref<64x128xf32, #tpu.memory_space<vmem>>, vector<8x128xf32>
    %216 = tpu.concatenate %213, %215 in 0 : vector<8x128xf32>, vector<8x128xf32> -> vector<16x128xf32>
    %c0_103 = arith.constant 0 : index
    %c0_104 = arith.constant 0 : index
    %217 = vector.load %arg18[%c0_103, %c0_104] : memref<16x32xf32, #tpu.memory_space<vmem>>, vector<16x32xf32>
    %c0_105 = arith.constant 0 : index
    %c0_106 = arith.constant 0 : index
    %218 = vector.load %arg19[%c0_105, %c0_106] : memref<16x32xf32, #tpu.memory_space<vmem>>, vector<16x32xf32>
    %219 = arith.truncf %217 : vector<16x32xf32> to vector<16x32xbf16>
    %cst_107 = arith.constant dense<0.000000e+00> : vector<16x128xf32>
    %220 = tpu.matmul %219, %11, %cst_107 {dimension_numbers = #tpu.dot_dimension_numbers<[1], [0], [0], [1], [0, 0, 1, 1], [], []>} : vector<16x32xbf16>, vector<32x128xbf16>, vector<16x128xf32> -> vector<16x128xf32>
    %221 = arith.addf %216, %220 : vector<16x128xf32>
    %222 = vector.extract_strided_slice %221 {offsets = [0, 0], sizes = [16, 96], strides = [1, 1]} : vector<16x128xf32> to vector<16x96xf32>
    %223 = arith.negf %222 : vector<16x96xf32>
    %224 = math.exp %223 : vector<16x96xf32>
    %cst_108 = arith.constant 1.000000e+00 : f32
    %225 = vector.broadcast %cst_108 : f32 to vector<16x96xf32>
    %226 = arith.addf %225, %224 : vector<16x96xf32>
    %227 = arith.divf %225, %226 : vector<16x96xf32>
    %228 = vector.extract_strided_slice %227 {offsets = [0, 0], sizes = [16, 32], strides = [1, 1]} : vector<16x96xf32> to vector<16x32xf32>
    %229 = vector.extract_strided_slice %227 {offsets = [0, 32], sizes = [16, 32], strides = [1, 1]} : vector<16x96xf32> to vector<16x32xf32>
    %230 = vector.extract_strided_slice %227 {offsets = [0, 64], sizes = [16, 32], strides = [1, 1]} : vector<16x96xf32> to vector<16x32xf32>
    %231 = vector.extract_strided_slice %221 {offsets = [0, 96], sizes = [16, 32], strides = [1, 1]} : vector<16x128xf32> to vector<16x32xf32>
    %232 = math.tanh %231 : vector<16x32xf32>
    %233 = arith.mulf %229, %218 : vector<16x32xf32>
    %234 = arith.mulf %228, %232 : vector<16x32xf32>
    %235 = arith.addf %233, %234 : vector<16x32xf32>
    %236 = math.tanh %235 : vector<16x32xf32>
    %237 = arith.mulf %230, %236 : vector<16x32xf32>
    %c0_109 = arith.constant 0 : index
    %c0_110 = arith.constant 0 : index
    %238 = vector.load %arg18[%c0_109, %c0_110] : memref<16x32xf32, #tpu.memory_space<vmem>>, vector<16x32xf32>
    tpu.vector_store %arg18[%c0_109, %c0_110], %237 {strides = array<i32>} : memref<16x32xf32, #tpu.memory_space<vmem>>, vector<16x32xf32>,
    %c0_111 = arith.constant 0 : index
    %c0_112 = arith.constant 0 : index
    %239 = vector.load %arg19[%c0_111, %c0_112] : memref<16x32xf32, #tpu.memory_space<vmem>>, vector<16x32xf32>
    tpu.vector_store %arg19[%c0_111, %c0_112], %235 {strides = array<i32>} : memref<16x32xf32, #tpu.memory_space<vmem>>, vector<16x32xf32>,
    %240 = vector.extract_strided_slice %237 {offsets = [0, 0], sizes = [8, 32], strides = [1, 1]} : vector<16x32xf32> to vector<8x32xf32>
    %241 = arith.index_cast %208 : i32 to index
    %c0_113 = arith.constant 0 : index
    %242 = vector.load %arg16[%241, %c0_113] : memref<64x32xf32, #tpu.memory_space<vmem>>, vector<8x32xf32>
    tpu.vector_store %arg16[%241, %c0_113], %240 {strides = array<i32>} : memref<64x32xf32, #tpu.memory_space<vmem>>, vector<8x32xf32>,
    %243 = vector.extract_strided_slice %237 {offsets = [8, 0], sizes = [8, 32], strides = [1, 1]} : vector<16x32xf32> to vector<8x32xf32>
    %244 = arith.index_cast %211 : i32 to index
    %c0_114 = arith.constant 0 : index
    %245 = vector.load %arg17[%244, %c0_114] : memref<64x32xf32, #tpu.memory_space<vmem>>, vector<8x32xf32>
    tpu.vector_store %arg17[%244, %c0_114], %243 {strides = array<i32>} : memref<64x32xf32, #tpu.memory_space<vmem>>, vector<8x32xf32>,
    %c6_i32 = arith.constant 6 : i32
    %c8_i32_115 = arith.constant 8 : i32
    %246 = arith.muli %c6_i32, %c8_i32_115 : i32
    %247 = tpu.assume_multiple %246, 8 : i32
    %c7_i32_116 = arith.constant 7 : i32
    %248 = arith.subi %c7_i32_116, %c6_i32 : i32
    %c8_i32_117 = arith.constant 8 : i32
    %249 = arith.muli %248, %c8_i32_117 : i32
    %250 = tpu.assume_multiple %249, 8 : i32
    %251 = arith.index_cast %247 : i32 to index
    %c0_118 = arith.constant 0 : index
    %252 = vector.load %arg15[%251, %c0_118] : memref<64x128xf32, #tpu.memory_space<vmem>>, vector<8x128xf32>
    %253 = arith.index_cast %250 : i32 to index
    %c0_119 = arith.constant 0 : index
    %254 = vector.load %arg15[%253, %c0_119] : memref<64x128xf32, #tpu.memory_space<vmem>>, vector<8x128xf32>
    %255 = tpu.concatenate %252, %254 in 0 : vector<8x128xf32>, vector<8x128xf32> -> vector<16x128xf32>
    %c0_120 = arith.constant 0 : index
    %c0_121 = arith.constant 0 : index
    %256 = vector.load %arg18[%c0_120, %c0_121] : memref<16x32xf32, #tpu.memory_space<vmem>>, vector<16x32xf32>
    %c0_122 = arith.constant 0 : index
    %c0_123 = arith.constant 0 : index
    %257 = vector.load %arg19[%c0_122, %c0_123] : memref<16x32xf32, #tpu.memory_space<vmem>>, vector<16x32xf32>
    %258 = arith.truncf %256 : vector<16x32xf32> to vector<16x32xbf16>
    %cst_124 = arith.constant dense<0.000000e+00> : vector<16x128xf32>
    %259 = tpu.matmul %258, %11, %cst_124 {dimension_numbers = #tpu.dot_dimension_numbers<[1], [0], [0], [1], [0, 0, 1, 1], [], []>} : vector<16x32xbf16>, vector<32x128xbf16>, vector<16x128xf32> -> vector<16x128xf32>
    %260 = arith.addf %255, %259 : vector<16x128xf32>
    %261 = vector.extract_strided_slice %260 {offsets = [0, 0], sizes = [16, 96], strides = [1, 1]} : vector<16x128xf32> to vector<16x96xf32>
    %262 = arith.negf %261 : vector<16x96xf32>
    %263 = math.exp %262 : vector<16x96xf32>
    %cst_125 = arith.constant 1.000000e+00 : f32
    %264 = vector.broadcast %cst_125 : f32 to vector<16x96xf32>
    %265 = arith.addf %264, %263 : vector<16x96xf32>
    %266 = arith.divf %264, %265 : vector<16x96xf32>
    %267 = vector.extract_strided_slice %266 {offsets = [0, 0], sizes = [16, 32], strides = [1, 1]} : vector<16x96xf32> to vector<16x32xf32>
    %268 = vector.extract_strided_slice %266 {offsets = [0, 32], sizes = [16, 32], strides = [1, 1]} : vector<16x96xf32> to vector<16x32xf32>
    %269 = vector.extract_strided_slice %266 {offsets = [0, 64], sizes = [16, 32], strides = [1, 1]} : vector<16x96xf32> to vector<16x32xf32>
    %270 = vector.extract_strided_slice %260 {offsets = [0, 96], sizes = [16, 32], strides = [1, 1]} : vector<16x128xf32> to vector<16x32xf32>
    %271 = math.tanh %270 : vector<16x32xf32>
    %272 = arith.mulf %268, %257 : vector<16x32xf32>
    %273 = arith.mulf %267, %271 : vector<16x32xf32>
    %274 = arith.addf %272, %273 : vector<16x32xf32>
    %275 = math.tanh %274 : vector<16x32xf32>
    %276 = arith.mulf %269, %275 : vector<16x32xf32>
    %c0_126 = arith.constant 0 : index
    %c0_127 = arith.constant 0 : index
    %277 = vector.load %arg18[%c0_126, %c0_127] : memref<16x32xf32, #tpu.memory_space<vmem>>, vector<16x32xf32>
    tpu.vector_store %arg18[%c0_126, %c0_127], %276 {strides = array<i32>} : memref<16x32xf32, #tpu.memory_space<vmem>>, vector<16x32xf32>,
    %c0_128 = arith.constant 0 : index
    %c0_129 = arith.constant 0 : index
    %278 = vector.load %arg19[%c0_128, %c0_129] : memref<16x32xf32, #tpu.memory_space<vmem>>, vector<16x32xf32>
    tpu.vector_store %arg19[%c0_128, %c0_129], %274 {strides = array<i32>} : memref<16x32xf32, #tpu.memory_space<vmem>>, vector<16x32xf32>,
    %279 = vector.extract_strided_slice %276 {offsets = [0, 0], sizes = [8, 32], strides = [1, 1]} : vector<16x32xf32> to vector<8x32xf32>
    %280 = arith.index_cast %247 : i32 to index
    %c0_130 = arith.constant 0 : index
    %281 = vector.load %arg16[%280, %c0_130] : memref<64x32xf32, #tpu.memory_space<vmem>>, vector<8x32xf32>
    tpu.vector_store %arg16[%280, %c0_130], %279 {strides = array<i32>} : memref<64x32xf32, #tpu.memory_space<vmem>>, vector<8x32xf32>,
    %282 = vector.extract_strided_slice %276 {offsets = [8, 0], sizes = [8, 32], strides = [1, 1]} : vector<16x32xf32> to vector<8x32xf32>
    %283 = arith.index_cast %250 : i32 to index
    %c0_131 = arith.constant 0 : index
    %284 = vector.load %arg17[%283, %c0_131] : memref<64x32xf32, #tpu.memory_space<vmem>>, vector<8x32xf32>
    tpu.vector_store %arg17[%283, %c0_131], %282 {strides = array<i32>} : memref<64x32xf32, #tpu.memory_space<vmem>>, vector<8x32xf32>,
    %c7_i32_132 = arith.constant 7 : i32
    %c8_i32_133 = arith.constant 8 : i32
    %285 = arith.muli %c7_i32_132, %c8_i32_133 : i32
    %286 = tpu.assume_multiple %285, 8 : i32
    %c7_i32_134 = arith.constant 7 : i32
    %287 = arith.subi %c7_i32_134, %c7_i32_132 : i32
    %c8_i32_135 = arith.constant 8 : i32
    %288 = arith.muli %287, %c8_i32_135 : i32
    %289 = tpu.assume_multiple %288, 8 : i32
    %290 = arith.index_cast %286 : i32 to index
    %c0_136 = arith.constant 0 : index
    %291 = vector.load %arg15[%290, %c0_136] : memref<64x128xf32, #tpu.memory_space<vmem>>, vector<8x128xf32>
    %292 = arith.index_cast %289 : i32 to index
    %c0_137 = arith.constant 0 : index
    %293 = vector.load %arg15[%292, %c0_137] : memref<64x128xf32, #tpu.memory_space<vmem>>, vector<8x128xf32>
    %294 = tpu.concatenate %291, %293 in 0 : vector<8x128xf32>, vector<8x128xf32> -> vector<16x128xf32>
    %c0_138 = arith.constant 0 : index
    %c0_139 = arith.constant 0 : index
    %295 = vector.load %arg18[%c0_138, %c0_139] : memref<16x32xf32, #tpu.memory_space<vmem>>, vector<16x32xf32>
    %c0_140 = arith.constant 0 : index
    %c0_141 = arith.constant 0 : index
    %296 = vector.load %arg19[%c0_140, %c0_141] : memref<16x32xf32, #tpu.memory_space<vmem>>, vector<16x32xf32>
    %297 = arith.truncf %295 : vector<16x32xf32> to vector<16x32xbf16>
    %cst_142 = arith.constant dense<0.000000e+00> : vector<16x128xf32>
    %298 = tpu.matmul %297, %11, %cst_142 {dimension_numbers = #tpu.dot_dimension_numbers<[1], [0], [0], [1], [0, 0, 1, 1], [], []>} : vector<16x32xbf16>, vector<32x128xbf16>, vector<16x128xf32> -> vector<16x128xf32>
    %299 = arith.addf %294, %298 : vector<16x128xf32>
    %300 = vector.extract_strided_slice %299 {offsets = [0, 0], sizes = [16, 96], strides = [1, 1]} : vector<16x128xf32> to vector<16x96xf32>
    %301 = arith.negf %300 : vector<16x96xf32>
    %302 = math.exp %301 : vector<16x96xf32>
    %cst_143 = arith.constant 1.000000e+00 : f32
    %303 = vector.broadcast %cst_143 : f32 to vector<16x96xf32>
    %304 = arith.addf %303, %302 : vector<16x96xf32>
    %305 = arith.divf %303, %304 : vector<16x96xf32>
    %306 = vector.extract_strided_slice %305 {offsets = [0, 0], sizes = [16, 32], strides = [1, 1]} : vector<16x96xf32> to vector<16x32xf32>
    %307 = vector.extract_strided_slice %305 {offsets = [0, 32], sizes = [16, 32], strides = [1, 1]} : vector<16x96xf32> to vector<16x32xf32>
    %308 = vector.extract_strided_slice %305 {offsets = [0, 64], sizes = [16, 32], strides = [1, 1]} : vector<16x96xf32> to vector<16x32xf32>
    %309 = vector.extract_strided_slice %299 {offsets = [0, 96], sizes = [16, 32], strides = [1, 1]} : vector<16x128xf32> to vector<16x32xf32>
    %310 = math.tanh %309 : vector<16x32xf32>
    %311 = arith.mulf %307, %296 : vector<16x32xf32>
    %312 = arith.mulf %306, %310 : vector<16x32xf32>
    %313 = arith.addf %311, %312 : vector<16x32xf32>
    %314 = math.tanh %313 : vector<16x32xf32>
    %315 = arith.mulf %308, %314 : vector<16x32xf32>
    %c0_144 = arith.constant 0 : index
    %c0_145 = arith.constant 0 : index
    %316 = vector.load %arg18[%c0_144, %c0_145] : memref<16x32xf32, #tpu.memory_space<vmem>>, vector<16x32xf32>
    tpu.vector_store %arg18[%c0_144, %c0_145], %315 {strides = array<i32>} : memref<16x32xf32, #tpu.memory_space<vmem>>, vector<16x32xf32>,
    %c0_146 = arith.constant 0 : index
    %c0_147 = arith.constant 0 : index
    %317 = vector.load %arg19[%c0_146, %c0_147] : memref<16x32xf32, #tpu.memory_space<vmem>>, vector<16x32xf32>
    tpu.vector_store %arg19[%c0_146, %c0_147], %313 {strides = array<i32>} : memref<16x32xf32, #tpu.memory_space<vmem>>, vector<16x32xf32>,
    %318 = vector.extract_strided_slice %315 {offsets = [0, 0], sizes = [8, 32], strides = [1, 1]} : vector<16x32xf32> to vector<8x32xf32>
    %319 = arith.index_cast %286 : i32 to index
    %c0_148 = arith.constant 0 : index
    %320 = vector.load %arg16[%319, %c0_148] : memref<64x32xf32, #tpu.memory_space<vmem>>, vector<8x32xf32>
    tpu.vector_store %arg16[%319, %c0_148], %318 {strides = array<i32>} : memref<64x32xf32, #tpu.memory_space<vmem>>, vector<8x32xf32>,
    %321 = vector.extract_strided_slice %315 {offsets = [8, 0], sizes = [8, 32], strides = [1, 1]} : vector<16x32xf32> to vector<8x32xf32>
    %322 = arith.index_cast %289 : i32 to index
    %c0_149 = arith.constant 0 : index
    %323 = vector.load %arg17[%322, %c0_149] : memref<64x32xf32, #tpu.memory_space<vmem>>, vector<8x32xf32>
    tpu.vector_store %arg17[%322, %c0_149], %321 {strides = array<i32>} : memref<64x32xf32, #tpu.memory_space<vmem>>, vector<8x32xf32>,
    %c8_i32_150 = arith.constant 8 : i32
    %c0_151 = arith.constant 0 : index
    %c0_152 = arith.constant 0 : index
    %324 = vector.load %arg4[%c0_151, %c0_152] : memref<32x32xbf16, #tpu.memory_space<vmem>>, vector<32x32xbf16>
    %c0_153 = arith.constant 0 : index
    %c0_154 = arith.constant 0 : index
    %325 = vector.load %arg5[%c0_153, %c0_154] : memref<32x32xbf16, #tpu.memory_space<vmem>>, vector<32x32xbf16>
    %c0_155 = arith.constant 0 : index
    %c0_156 = arith.constant 0 : index
    %326 = vector.load %arg16[%c0_155, %c0_156] : memref<64x32xf32, #tpu.memory_space<vmem>>, vector<64x32xf32>
    %327 = arith.truncf %326 : vector<64x32xf32> to vector<64x32xbf16>
    %cst_157 = arith.constant dense<0.000000e+00> : vector<64x32xf32>
    %328 = tpu.matmul %327, %324, %cst_157 {dimension_numbers = #tpu.dot_dimension_numbers<[1], [0], [0], [1], [0, 0, 1, 1], [], []>} : vector<64x32xbf16>, vector<32x32xbf16>, vector<64x32xf32> -> vector<64x32xf32>
    %c0_158 = arith.constant 0 : index
    %c0_159 = arith.constant 0 : index
    %329 = vector.load %arg17[%c0_158, %c0_159] : memref<64x32xf32, #tpu.memory_space<vmem>>, vector<64x32xf32>
    %330 = arith.truncf %329 : vector<64x32xf32> to vector<64x32xbf16>
    %cst_160 = arith.constant dense<0.000000e+00> : vector<64x32xf32>
    %331 = tpu.matmul %330, %325, %cst_160 {dimension_numbers = #tpu.dot_dimension_numbers<[1], [0], [0], [1], [0, 0, 1, 1], [], []>} : vector<64x32xbf16>, vector<32x32xbf16>, vector<64x32xf32> -> vector<64x32xf32>
    %332 = arith.addf %328, %331 : vector<64x32xf32>
    %c0_161 = arith.constant 0 : index
    %c0_162 = arith.constant 0 : index
    %333 = vector.load %arg0[%c0_161, %c0_162] : memref<64x32xbf16, #tpu.memory_space<vmem>>, vector<64x32xbf16>
    %c0_163 = arith.constant 0 : index
    %c0_164 = arith.constant 0 : index
    %334 = vector.load %arg6[%c0_163, %c0_164] : memref<32x32xbf16, #tpu.memory_space<vmem>>, vector<32x32xbf16>
    %cst_165 = arith.constant dense<0.000000e+00> : vector<64x32xf32>
    %335 = tpu.matmul %333, %334, %cst_165 {dimension_numbers = #tpu.dot_dimension_numbers<[1], [0], [0], [1], [0, 0, 1, 1], [], []>} : vector<64x32xbf16>, vector<32x32xbf16>, vector<64x32xf32> -> vector<64x32xf32>
    %336 = arith.addf %332, %335 : vector<64x32xf32>
    %c0_166 = arith.constant 0 : index
    %c0_167 = arith.constant 0 : index
    %337 = vector.load %arg7[%c0_166, %c0_167] : memref<1x32xf32, #tpu.memory_space<vmem>>, vector<1x32xf32>
    %338 = vector.broadcast %337 : vector<1x32xf32> to vector<64x32xf32>
    %339 = arith.addf %336, %338 : vector<64x32xf32>
    %c0_168 = arith.constant 0 : index
    %c0_169 = arith.constant 0 : index
    %340 = vector.load %arg12[%c0_168, %c0_169] : memref<64x32xf32, #tpu.memory_space<vmem>>, vector<64x32xf32>
    tpu.vector_store %arg12[%c0_168, %c0_169], %339 {strides = array<i32>} : memref<64x32xf32, #tpu.memory_space<vmem>>, vector<64x32xf32>,
    %c0_170 = arith.constant 0 : index
    %c0_171 = arith.constant 0 : index
    %341 = vector.load %arg8[%c0_170, %c0_171] : memref<64x32xbf16, #tpu.memory_space<vmem>>, vector<64x32xbf16>
    %c0_172 = arith.constant 0 : index
    %c0_173 = arith.constant 0 : index
    %342 = vector.load %arg9[%c0_172, %c0_173] : memref<64x32xbf16, #tpu.memory_space<vmem>>, vector<64x32xbf16>
    %c0_174 = arith.constant 0 : index
    %c0_175 = arith.constant 0 : index
    %343 = vector.load %arg18[%c0_174, %c0_175] : memref<16x32xf32, #tpu.memory_space<vmem>>, vector<16x32xf32>
    %c0_176 = arith.constant 0 : index
    %c0_177 = arith.constant 0 : index
    %344 = vector.load %arg19[%c0_176, %c0_177] : memref<16x32xf32, #tpu.memory_space<vmem>>, vector<16x32xf32>
    %345 = vector.extract_strided_slice %343 {offsets = [0, 0], sizes = [8, 32], strides = [1, 1]} : vector<16x32xf32> to vector<8x32xf32>
    %346 = vector.extract_strided_slice %343 {offsets = [8, 0], sizes = [8, 32], strides = [1, 1]} : vector<16x32xf32> to vector<8x32xf32>
    %347 = tpu.concatenate %345, %346 in 1 : vector<8x32xf32>, vector<8x32xf32> -> vector<8x64xf32>
    %348 = arith.truncf %347 : vector<8x64xf32> to vector<8x64xbf16>
    %349 = vector.extract_strided_slice %344 {offsets = [0, 0], sizes = [8, 32], strides = [1, 1]} : vector<16x32xf32> to vector<8x32xf32>
    %350 = vector.extract_strided_slice %344 {offsets = [8, 0], sizes = [8, 32], strides = [1, 1]} : vector<16x32xf32> to vector<8x32xf32>
    %351 = tpu.concatenate %349, %350 in 1 : vector<8x32xf32>, vector<8x32xf32> -> vector<8x64xf32>
    %352 = arith.truncf %351 : vector<8x64xf32> to vector<8x64xbf16>
    %cst_178 = arith.constant dense<0.000000e+00> : vector<8x32xf32>
    %353 = tpu.matmul %348, %341, %cst_178 {dimension_numbers = #tpu.dot_dimension_numbers<[1], [0], [0], [1], [0, 0, 1, 1], [], []>} : vector<8x64xbf16>, vector<64x32xbf16>, vector<8x32xf32> -> vector<8x32xf32>
    %c0_179 = arith.constant 0 : index
    %c0_180 = arith.constant 0 : index
    %354 = vector.load %arg10[%c0_179, %c0_180] : memref<1x32xf32, #tpu.memory_space<vmem>>, vector<1x32xf32>
    %355 = vector.broadcast %354 : vector<1x32xf32> to vector<8x32xf32>
    %356 = arith.addf %353, %355 : vector<8x32xf32>
    %c0_181 = arith.constant 0 : index
    %c0_182 = arith.constant 0 : index
    %357 = vector.load %arg13[%c0_181, %c0_182] : memref<8x32xf32, #tpu.memory_space<vmem>>, vector<8x32xf32>
    tpu.vector_store %arg13[%c0_181, %c0_182], %356 {strides = array<i32>} : memref<8x32xf32, #tpu.memory_space<vmem>>, vector<8x32xf32>,
    %cst_183 = arith.constant dense<0.000000e+00> : vector<8x32xf32>
    %358 = tpu.matmul %352, %342, %cst_183 {dimension_numbers = #tpu.dot_dimension_numbers<[1], [0], [0], [1], [0, 0, 1, 1], [], []>} : vector<8x64xbf16>, vector<64x32xbf16>, vector<8x32xf32> -> vector<8x32xf32>
    %c0_184 = arith.constant 0 : index
    %c0_185 = arith.constant 0 : index
    %359 = vector.load %arg11[%c0_184, %c0_185] : memref<1x32xf32, #tpu.memory_space<vmem>>, vector<1x32xf32>
    %360 = vector.broadcast %359 : vector<1x32xf32> to vector<8x32xf32>
    %361 = arith.addf %358, %360 : vector<8x32xf32>
    %c0_186 = arith.constant 0 : index
    %c0_187 = arith.constant 0 : index
    %362 = vector.load %arg14[%c0_186, %c0_187] : memref<8x32xf32, #tpu.memory_space<vmem>>, vector<8x32xf32>
    tpu.vector_store %arg14[%c0_186, %c0_187], %361 {strides = array<i32>} : memref<8x32xf32, #tpu.memory_space<vmem>>, vector<8x32xf32>,
    return
  }
}

</mosaic_0001>

<bundles_post_ra>
// kernel: tpu_custom_call.1
= control target key start
LH: loop header
LB: loop body
LE: loop exit
PB: predicated region body
PF: predicated region fallthrough
CT: control target
= control target key end

     0   :  { %20 = vsyncpa [#allocation8], 0  ;;  %vm47_vm0 = vcmask 261120   ;;  %v2330_v3 = vmov 0.0   ;;  %vm2331_vm1 = vmmov 0   ;;  %s2332_s28 = smov 32   ;;  %s2827_s0 = inlined_call_operand.vmem [shape: bf16[64,32], index: 0, kind: input, shape index: {}]   ;;  %s2828_s1 = inlined_call_operand.vmem [shape: bf16[32,128], index: 1, kind: input, shape index: {}]   ;;  %s2829_s2 = inlined_call_operand.vmem [shape: bf16[32,128], index: 2, kind: input, shape index: {}]   ;;  %s2830_s3 = inlined_call_operand.vmem [shape: f32[1,128], index: 3, kind: input, shape index: {}]   ;;  %s2831_s4 = inlined_call_operand.vmem [shape: bf16[32,32], index: 4, kind: input, shape index: {}]   ;;  %s2832_s5 = inlined_call_operand.vmem [shape: bf16[32,32], index: 5, kind: input, shape index: {}]   ;;  %s2833_s6 = inlined_call_operand.vmem [shape: bf16[32,32], index: 6, kind: input, shape index: {}]   ;;  %s2834_s7 = inlined_call_operand.vmem [shape: f32[1,32], index: 7, kind: input, shape index: {}]   ;;  %s2835_s8 = inlined_call_operand.vmem [shape: bf16[64,32], index: 8, kind: input, shape index: {}]   ;;  %s2836_s9 = inlined_call_operand.vmem [shape: bf16[64,32], index: 9, kind: input, shape index: {}]   ;;  %s2837_s10 = inlined_call_operand.vmem [shape: f32[1,32], index: 10, kind: input, shape index: {}]   ;;  %s2838_s11 = inlined_call_operand.vmem [shape: f32[1,32], index: 11, kind: input, shape index: {}]   ;;  %s2839_s12 = inlined_call_operand.vmem [shape: f32[64,32], index: 12, kind: output, shape index: {0}]   ;;  %s2840_s13 = inlined_call_operand.hbm [shape: f32[8,32], index: 13, kind: output, shape index: {1}]   ;;  %s2841_s14 = inlined_call_operand.hbm [shape: f32[8,32], index: 14, kind: output, shape index: {2}]  }
   0x1   :  { %v2132_v0 = vld [vmem:[%s2828_s1 + $0x8] sm:$0xff]   ;;  %v2133_v1 = vld [vmem:[%s2828_s1] sm:$0xff]   ;;  %48 = vst.msk [vmem:[#allocation5] sm:$0xff] %vm47_vm0, %v2330_v3  ;;  %49 = vst.msk [vmem:[#allocation5 + $0x8] sm:$0xff] %vm47_vm0, %v2330_v3 }
   0x2   :  { %1980 = vmatprep.subr.bf16.mxu0 %v2132_v0  ;;  %2116 = vmatprep.subr.bf16.mxu1 %v2132_v0  ;;  %v2134_v2 = vld [vmem:[%s2827_s0] sm:$0xff]   ;;  %50 = vst.msk [vmem:[#allocation6] sm:$0xff] %vm47_vm0, %v2330_v3  ;;  %51 = vst.msk [vmem:[#allocation6 + $0x8] sm:$0xff] %vm47_vm0, %v2330_v3  ;;  %v2135_v4 = vld [vmem:[%s2827_s0 + $0x10] sm:$0xff]  }
   0x3   :  { %1981 = vmatpush3.bf16.msra.mxu0 %v2132_v0  ;;  %2118 = vmatpush3.bf16.msra.mxu1 %v2132_v0  ;;  %v2136_v5 = vld [vmem:[%s2827_s0 + $0x8] sm:$0xff]   ;;  %v2137_v6 = vld [vmem:[%s2827_s0 + $0x18] sm:$0xff]   ;;  %v2450_v8 = vld [vmem:[%s2829_s2] sm:$0xff]  }
   0x4   :  { %1982 = vmatprep.subr.bf16.mxu0 %v2133_v1  ;;  %2117 = vmatprep.subr.bf16.mxu1 %v2133_v1  ;;  %v2443_v7 = vld [vmem:[%s2829_s2 + $0x8] sm:$0xff]  }
   0x5   :  { %1984 = vmatprep.mubr.msk.bf16.mxu0 %vm47_vm0, %v2134_v2  ;;  %1988 = vmatprep.mubr.msk.bf16.mxu1 %vm47_vm0, %v2135_v4 }
   0x7   :  { %1983 = vmatpush3.bf16.msra.mxu0 %v2133_v1  ;;  %2119 = vmatpush3.bf16.msra.mxu1 %v2133_v1 }
   0x8   :  { %1992 = vmatprep.subr.bf16.mxu1 %v2330_v3  ;;  %2008 = vmatprep.subr.bf16.mxu0 %v2330_v3  ;;  %v195_v9 = vld [vmem:[#allocation5] sm:$0xff]  ;;  %v196_v11 = vld [vmem:[#allocation5 + $0x8] sm:$0xff] }
   0x9   :  { %v197_v10 = vld [vmem:[#allocation6] sm:$0xff]  ;;  %v198_v12 = vld [vmem:[#allocation6 + $0x8] sm:$0xff]  ;;  %v199_v13 = vpack.c.bf16 %v196_v11, %v195_v9 }
   0xa   :  { %1985 = vmatmul.mubr.msk.bf16.vlgmr.msra.gmra.mxu0 %vm47_vm0, %v2136_v5  ;;  %1989 = vmatmul.mubr.msk.bf16.vlgmr.msra.gmra.mxu1 %vm47_vm0, %v2137_v6 }
   0xb   :  { %1993 = vmatpush3.bf16.msra.mxu1 %v2443_v7  ;;  %1996 = vmatprep.mubr.msk.bf16.mxu1 %vm2331_vm1, %v2330_v3 }
   0xc   :  { %1994 = vmatprep.subr.bf16.mxu1 %v2330_v3  ;;  %274 = vrot.lane.b32.xlu1 %v197_v10, %s2332_s28 }
   0xd   :  { %2009 = vmatpush3.bf16.msra.mxu0 %v2443_v7  ;;  %2012 = vmatprep.mubr.msk.bf16.mxu0 %vm2331_vm1, %v2330_v3 }
   0xe   :  { %2010 = vmatprep.subr.bf16.mxu0 %v2330_v3 }
   0xf   :  { %1995 = vmatpush3.bf16.msra.mxu1 %v2450_v8 }
  0x10   :  { %276 = vrot.lane.b32.xlu1 %v198_v12, %s2332_s28  ;;  %2000 = vmatprep.subr.bf16.mxu1 %v2330_v3 }
  0x11   :  { %2011 = vmatpush3.bf16.msra.mxu0 %v2450_v8 }
  0x12   :  { %1997 = vmatmul.mubr.msk.bf16.vlgmr.msra.gmra.mxu1 %vm47_vm0, %v199_v13  ;;  %2024 = vmatprep.subr.bf16.mxu0 %v2330_v3 }
  0x13   :  { %2001 = vmatpush3.bf16.msra.mxu1 %v2443_v7  ;;  %2004 = vmatprep.mubr.msk.bf16.mxu1 %vm2331_vm1, %v2330_v3 }
  0x14   :  { %2002 = vmatprep.subr.bf16.mxu1 %v2330_v3 }
  0x15   :  { %21 = vsyncpa [#allocation10], 0  ;;  %v2478_v14 = vld [vmem:[%s2830_s3] ss:$0 sm:$0xff]  ;;  %s2333_s3 = smov 64   ;;  %s2334_s30 = smov 96  }
  0x16   :  { %vm1698_vm2 = vcmask 523264   ;;  %s2335_s22 = smov [#allocation7]   ;;  %s2336_s23 = smov [#allocation9]  }
  0x17   :  { %2003 = vmatpush3.bf16.msra.mxu1 %v2450_v8  ;;  %s1836_s24 = sshll.u32 %s2336_s23, 4  ;;  %s1837_s24 = int_to_ptr.vmem [resolvable:$true] %s1836_s24 }
  0x18   :  { %2016 = vmatprep.subr.bf16.mxu1 %v2330_v3 }
  0x7e   :  { %v275_v49 = vpop.permute.xlu1 %274 }
  0x82   :  { %v277_v51 = vpop.permute.xlu1 %276 }
  0xca   :  { %v1986_v15 = vpop.f32.mrf.mxu0  ;;  %v1990_v16 = vpop.f32.mrf.mxu1 }
  0xcb   :  { %v2481_v17 = vadd.f32 %v1986_v15, %v2478_v14  ;;  %v2484_v18 = vadd.f32 %v1990_v16, %v2478_v14 }
  0xcc   :  { %v149_v19 = vpop.f32.mrf.mxu0  ;;  %v165_v20 = vpop.f32.mrf.mxu1 }
  0xcd   :  { %v2487_v21 = vadd.f32 %v2478_v14, %v165_v20  ;;  %v2493_v26 = vadd.f32 %v2478_v14, %v149_v19 }
  0xce   :  { %v1987_v22 = vpop.f32.mrf.mxu0  ;;  %v1991_v23 = vpop.f32.mrf.mxu1 }
  0xcf   :  { %v2490_v24 = vadd.f32 %v1987_v22, %v2478_v14  ;;  %v2500_v31 = vadd.f32 %v1991_v23, %v2478_v14 }
  0xd0   :  { %v168_v25 = vpop.f32.mrf.mxu1  ;;  %v152_v9 = vpop.f32.mrf.mxu0 }
  0xd1   :  { %v2496_v27 = vadd.f32 %v2478_v14, %v168_v25  ;;  %v2527_v10 = vadd.f32 %v2478_v14, %v152_v9 }
  0xd2   :  { %v249_v28 = vpop.f32.mrf.mxu1 }
  0xd3   :  { %v256_v29 = vadd.f32 %v249_v28, %v2493_v26 }
  0xd4   :  { %v1998_v30 = vpop.f32.mrf.mxu1 }
  0xd5   :  { %2158 = vtanh.f32 %v256_v29  ;;  %v1864_v37 = vmul.f32 -1.442695, %v256_v29 }
  0xd6   :  { %v252_v32 = vpop.f32.mrf.mxu1 }
  0xd7   :  { %v257_v33 = vadd.f32 %v252_v32, %v2500_v31 }
  0xd8   :  { %v1999_v34 = vpop.f32.mrf.mxu1 }
  0xd9   :  { %2160 = vtanh.f32 %v257_v33  ;;  %v1865_v38 = vmul.f32 -1.442695, %v257_v33 }
  0xda   :  { %2162 = vpow2.f32 %v1864_v37 }
  0xdb   :  { %2164 = vpow2.f32 %v1865_v38 }
  0xe2   :  { %v2159_v35 = vpop.eup %2158 }
  0xe3   :  { %284 = vrot.lane.b32.xlu0 %v2159_v35, %s2332_s28 }
  0xe6   :  { %v2161_v36 = vpop.eup %2160 }
  0xe7   :  { %286 = vrot.lane.b32.xlu0 %v2161_v36, %s2332_s28  ;;  %v2163_v39 = vpop.eup %2162 }
  0xe8   :  { %v264_v40 = vadd.f32 1.0, %v2163_v39  ;;  %v2165_v41 = vpop.eup %2164 }
  0xe9   :  { %v265_v42 = vadd.f32 1.0, %v2165_v41 }
  0xea   :  { %2166 = vrcp.f32 %v264_v40 }
  0xeb   :  { %2168 = vrcp.f32 %v265_v42 }
  0xf7   :  { %v2167_v43 = vpop.eup %2166 }
  0xf8   :  { %v2169_v46 = vpop.eup %2168  ;;  %v280_v50 = vmul.f32 %v2167_v43, %v275_v49 }
  0xf9   :  { %v281_v54 = vmul.f32 %v2169_v46, %v277_v51 }
 0x155   :  { %v285_v44 = vpop.permute.xlu0 %284 }
 0x156   :  { %v290_v45 = vmul.f32 %v2167_v43, %v285_v44 }
 0x158   :  { %294 = vrot.lane.b32.xlu0 %v290_v45, %s2332_s28 }
 0x159   :  { %v287_v47 = vpop.permute.xlu0 %286 }
 0x15a   :  { %v291_v48 = vmul.f32 %v2169_v46, %v287_v47 }
 0x15c   :  { %296 = vrot.lane.b32.xlu1 %v291_v48, %s2332_s28 }
 0x1ca   :  { %v295_v52 = vpop.permute.xlu0 %294 }
 0x1cb   :  { %v300_v53 = vadd.f32 %v295_v52, %v280_v50 }
 0x1cd   :  { %2170 = vtanh.f32 %v300_v53 }
 0x1ce   :  { %v297_v55 = vpop.permute.xlu1 %296 }
 0x1cf   :  { %v301_v56 = vadd.f32 %v297_v55, %v281_v54 }
 0x1d1   :  { %2172 = vtanh.f32 %v301_v56 }
 0x1da   :  { %v2171_v57 = vpop.eup %2170 }
 0x1db   :  { %306 = vrot.lane.b32.xlu0 %v2171_v57, %s2332_s28 }
 0x1de   :  { %v2173_v58 = vpop.eup %2172 }
 0x1df   :  { %308 = vrot.lane.b32.xlu1 %v2173_v58, %s2332_s28 }
 0x24d   :  { %v307_v59 = vpop.permute.xlu0 %306 }
 0x24e   :  { %v312_v60 = vmul.f32 %v2167_v43, %v307_v59 }
 0x250   :  { %316 = vrot.lane.b32.xlu0 %v312_v60, %s2333_s3 }
 0x251   :  { %v309_v61 = vpop.permute.xlu1 %308 }
 0x252   :  { %v313_v62 = vmul.f32 %v2169_v46, %v309_v61 }
 0x254   :  { %326 = vrot.lane.b32.xlu0 %v300_v53, %s2334_s30  ;;  %318 = vrot.lane.b32.xlu1 %v313_v62, %s2333_s3 }
 0x258   :  { %328 = vrot.lane.b32.xlu1 %v301_v56, %s2334_s30 }
 0x2c2   :  { %v317_v63 = vpop.permute.xlu0 %316 }
 0x2c3   :  { %322 = vst.msk [vmem:[#allocation5] sm:$0xff] %vm47_vm0, %v317_v63  ;;  %334 = vst.msk [vmem:[#allocation3] sm:$0xff] %vm47_vm0, %v317_v63 }
 0x2c6   :  { %v327_v0 = vpop.permute.xlu0 %326  ;;  %v319_v1 = vpop.permute.xlu1 %318 }
 0x2c7   :  { %332 = vst.msk [vmem:[#allocation6] sm:$0xff] %vm47_vm0, %v327_v0  ;;  %323 = vst.msk [vmem:[#allocation5 + $0x8] sm:$0xff] %vm47_vm0, %v319_v1 }
 0x2c8   :  { %336 = vst.msk [vmem:[#allocation4 + $0x38] sm:$0xff] %vm47_vm0, %v319_v1 }
 0x2ca   :  { %v329_v2 = vpop.permute.xlu1 %328  ;;  %v341_v4 = vld [vmem:[#allocation5] sm:$0xff] }
 0x2cb   :  { %333 = vst.msk [vmem:[#allocation6 + $0x8] sm:$0xff] %vm47_vm0, %v329_v2 }
 0x2ce   :  { %v342_v5 = vld [vmem:[#allocation5 + $0x8] sm:$0xff]  ;;  %v343_v23 = vld [vmem:[#allocation6] sm:$0xff] }
 0x2cf   :  { %v345_v6 = vpack.c.bf16 %v342_v5, %v341_v4 }
 0x2d1   :  { %2005 = vmatmul.mubr.msk.bf16.vlgmr.msra.gmra.mxu1 %vm47_vm0, %v345_v6 }
 0x2d2   :  { %2017 = vmatpush3.bf16.msra.mxu1 %v2443_v7  ;;  %2020 = vmatprep.mubr.msk.bf16.mxu1 %vm2331_vm1, %v2330_v3  ;;  %v344_v14 = vld [vmem:[#allocation6 + $0x8] sm:$0xff] }
 0x2d3   :  { %2018 = vmatprep.subr.bf16.mxu1 %v2330_v3 }
 0x2d6   :  { %2019 = vmatpush3.bf16.msra.mxu1 %v2450_v8 }
 0x2d7   :  { %2032 = vmatprep.subr.bf16.mxu1 %v2330_v3 }
 0x391   :  { %v383_v11 = vpop.f32.mrf.mxu1 }
 0x392   :  { %v390_v12 = vadd.f32 %v383_v11, %v2527_v10 }
 0x393   :  { %v2006_v13 = vpop.f32.mrf.mxu1 }
 0x394   :  { %2174 = vtanh.f32 %v390_v12  ;;  %v1867_v25 = vmul.f32 -1.442695, %v390_v12 }
 0x395   :  { %v386_v15 = vpop.f32.mrf.mxu1 }
 0x396   :  { %v391_v16 = vadd.f32 %v386_v15, %v2484_v18 }
 0x397   :  { %v2007_v19 = vpop.f32.mrf.mxu1 }
 0x398   :  { %2176 = vtanh.f32 %v391_v16  ;;  %v1868_v28 = vmul.f32 -1.442695, %v391_v16 }
 0x399   :  { %2178 = vpow2.f32 %v1867_v25 }
 0x39a   :  { %2180 = vpow2.f32 %v1868_v28 }
 0x3a1   :  { %v2175_v20 = vpop.eup %2174 }
 0x3a2   :  { %418 = vrot.lane.b32.xlu0 %v2175_v20, %s2332_s28 }
 0x3a5   :  { %v2177_v22 = vpop.eup %2176 }
 0x3a6   :  { %408 = vrot.lane.b32.xlu0 %v343_v23, %s2332_s28  ;;  %420 = vrot.lane.b32.xlu1 %v2177_v22, %s2332_s28  ;;  %v2179_v29 = vpop.eup %2178 }
 0x3a7   :  { %v398_v30 = vadd.f32 1.0, %v2179_v29  ;;  %v2181_v32 = vpop.eup %2180 }
 0x3a8   :  { %v399_v33 = vadd.f32 1.0, %v2181_v32 }
 0x3a9   :  { %2182 = vrcp.f32 %v398_v30 }
 0x3aa   :  { %410 = vrot.lane.b32.xlu1 %v344_v14, %s2332_s28  ;;  %2184 = vrcp.f32 %v399_v33 }
 0x3b6   :  { %v2183_v34 = vpop.eup %2182 }
 0x3b7   :  { %v2185_v37 = vpop.eup %2184 }
 0x414   :  { %v419_v35 = vpop.permute.xlu0 %418 }
 0x415   :  { %v424_v36 = vmul.f32 %v2183_v34, %v419_v35 }
 0x417   :  { %428 = vrot.lane.b32.xlu0 %v424_v36, %s2332_s28 }
 0x418   :  { %v421_v38 = vpop.permute.xlu1 %420  ;;  %v409_v40 = vpop.permute.xlu0 %408 }
 0x419   :  { %v425_v39 = vmul.f32 %v2185_v37, %v421_v38  ;;  %v414_v41 = vmul.f32 %v2183_v34, %v409_v40 }
 0x41b   :  { %430 = vrot.lane.b32.xlu1 %v425_v39, %s2332_s28 }
 0x41c   :  { %v411_v42 = vpop.permute.xlu1 %410 }
 0x41d   :  { %v415_v45 = vmul.f32 %v2185_v37, %v411_v42 }
 0x489   :  { %v429_v43 = vpop.permute.xlu0 %428 }
 0x48a   :  { %v434_v44 = vadd.f32 %v429_v43, %v414_v41 }
 0x48c   :  { %2186 = vtanh.f32 %v434_v44 }
 0x48d   :  { %v431_v46 = vpop.permute.xlu1 %430 }
 0x48e   :  { %v435_v47 = vadd.f32 %v431_v46, %v415_v45 }
 0x490   :  { %2188 = vtanh.f32 %v435_v47 }
 0x499   :  { %v2187_v48 = vpop.eup %2186 }
 0x49a   :  { %440 = vrot.lane.b32.xlu0 %v2187_v48, %s2332_s28 }
 0x49d   :  { %v2189_v49 = vpop.eup %2188 }
 0x49e   :  { %442 = vrot.lane.b32.xlu1 %v2189_v49, %s2332_s28 }
 0x50c   :  { %v441_v50 = vpop.permute.xlu0 %440 }
 0x50d   :  { %v446_v51 = vmul.f32 %v2183_v34, %v441_v50 }
 0x50f   :  { %450 = vrot.lane.b32.xlu0 %v446_v51, %s2333_s3 }
 0x510   :  { %v443_v52 = vpop.permute.xlu1 %442 }
 0x511   :  { %v447_v53 = vmul.f32 %v2185_v37, %v443_v52 }
 0x513   :  { %460 = vrot.lane.b32.xlu0 %v434_v44, %s2334_s30  ;;  %452 = vrot.lane.b32.xlu1 %v447_v53, %s2333_s3 }
 0x517   :  { %462 = vrot.lane.b32.xlu1 %v435_v47, %s2334_s30 }
 0x581   :  { %v451_v54 = vpop.permute.xlu0 %450 }
 0x582   :  { %456 = vst.msk [vmem:[#allocation5] sm:$0xff] %vm47_vm0, %v451_v54  ;;  %469 = vst.msk [vmem:[#allocation3 + $0x8] sm:$0xff] %vm47_vm0, %v451_v54 }
 0x585   :  { %v461_v55 = vpop.permute.xlu0 %460  ;;  %v453_v56 = vpop.permute.xlu1 %452 }
 0x586   :  { %466 = vst.msk [vmem:[#allocation6] sm:$0xff] %vm47_vm0, %v461_v55  ;;  %457 = vst.msk [vmem:[#allocation5 + $0x8] sm:$0xff] %vm47_vm0, %v453_v56 }
 0x587   :  { %471 = vst.msk [vmem:[#allocation4 + $0x30] sm:$0xff] %vm47_vm0, %v453_v56 }
 0x589   :  { %v463_v57 = vpop.permute.xlu1 %462  ;;  %v476_v58 = vld [vmem:[#allocation5] sm:$0xff] }
 0x58a   :  { %467 = vst.msk [vmem:[#allocation6 + $0x8] sm:$0xff] %vm47_vm0, %v463_v57 }
 0x58d   :  { %v477_v59 = vld [vmem:[#allocation5 + $0x8] sm:$0xff]  ;;  %v478_v6 = vld [vmem:[#allocation6] sm:$0xff] }
 0x58e   :  { %v480_v60 = vpack.c.bf16 %v477_v59, %v476_v58 }
 0x590   :  { %2013 = vmatmul.mubr.msk.bf16.vlgmr.msra.gmra.mxu0 %vm47_vm0, %v480_v60 }
 0x591   :  { %2025 = vmatpush3.bf16.msra.mxu0 %v2443_v7  ;;  %2028 = vmatprep.mubr.msk.bf16.mxu0 %vm2331_vm1, %v2330_v3  ;;  %v479_v9 = vld [vmem:[#allocation6 + $0x8] sm:$0xff] }
 0x592   :  { %2026 = vmatprep.subr.bf16.mxu0 %v2330_v3 }
 0x595   :  { %2027 = vmatpush3.bf16.msra.mxu0 %v2450_v8 }
 0x596   :  { %2040 = vmatprep.subr.bf16.mxu0 %v2330_v3 }
 0x650   :  { %v518_v61 = vpop.f32.mrf.mxu0 }
 0x651   :  { %v525_v62 = vadd.f32 %v518_v61, %v2481_v17 }
 0x652   :  { %v2014_v63 = vpop.f32.mrf.mxu0 }
 0x653   :  { %2190 = vtanh.f32 %v525_v62  ;;  %v1870_v11 = vmul.f32 -1.442695, %v525_v62 }
 0x654   :  { %v521_v0 = vpop.f32.mrf.mxu0 }
 0x655   :  { %v526_v1 = vadd.f32 %v521_v0, %v2496_v27 }
 0x656   :  { %v2015_v2 = vpop.f32.mrf.mxu0 }
 0x657   :  { %2192 = vtanh.f32 %v526_v1  ;;  %v1871_v12 = vmul.f32 -1.442695, %v526_v1 }
 0x658   :  { %2194 = vpow2.f32 %v1870_v11 }
 0x659   :  { %2196 = vpow2.f32 %v1871_v12 }
 0x660   :  { %v2191_v4 = vpop.eup %2190 }
 0x661   :  { %553 = vrot.lane.b32.xlu0 %v2191_v4, %s2332_s28 }
 0x664   :  { %v2193_v5 = vpop.eup %2192 }
 0x665   :  { %543 = vrot.lane.b32.xlu0 %v478_v6, %s2332_s28  ;;  %555 = vrot.lane.b32.xlu1 %v2193_v5, %s2332_s28  ;;  %v2195_v13 = vpop.eup %2194 }
 0x666   :  { %v533_v15 = vadd.f32 1.0, %v2195_v13  ;;  %v2197_v16 = vpop.eup %2196 }
 0x667   :  { %v534_v19 = vadd.f32 1.0, %v2197_v16 }
 0x668   :  { %2198 = vrcp.f32 %v533_v15 }
 0x669   :  { %545 = vrot.lane.b32.xlu1 %v479_v9, %s2332_s28  ;;  %2200 = vrcp.f32 %v534_v19 }
 0x675   :  { %v2199_v20 = vpop.eup %2198 }
 0x676   :  { %v2201_v14 = vpop.eup %2200 }
 0x6d3   :  { %v554_v22 = vpop.permute.xlu0 %553 }
 0x6d4   :  { %v559_v23 = vmul.f32 %v2199_v20, %v554_v22 }
 0x6d6   :  { %563 = vrot.lane.b32.xlu0 %v559_v23, %s2332_s28 }
 0x6d7   :  { %v556_v25 = vpop.permute.xlu1 %555  ;;  %v544_v29 = vpop.permute.xlu0 %543 }
 0x6d8   :  { %v560_v28 = vmul.f32 %v2201_v14, %v556_v25  ;;  %v549_v30 = vmul.f32 %v2199_v20, %v544_v29 }
 0x6da   :  { %565 = vrot.lane.b32.xlu1 %v560_v28, %s2332_s28 }
 0x6db   :  { %v546_v32 = vpop.permute.xlu1 %545 }
 0x6dc   :  { %v550_v35 = vmul.f32 %v2201_v14, %v546_v32 }
 0x748   :  { %v564_v33 = vpop.permute.xlu0 %563 }
 0x749   :  { %v569_v34 = vadd.f32 %v564_v33, %v549_v30 }
 0x74b   :  { %2202 = vtanh.f32 %v569_v34 }
 0x74c   :  { %v566_v36 = vpop.permute.xlu1 %565 }
 0x74d   :  { %v570_v37 = vadd.f32 %v566_v36, %v550_v35 }
 0x74f   :  { %2204 = vtanh.f32 %v570_v37 }
 0x758   :  { %v2203_v38 = vpop.eup %2202 }
 0x759   :  { %575 = vrot.lane.b32.xlu0 %v2203_v38, %s2332_s28 }
 0x75c   :  { %v2205_v39 = vpop.eup %2204 }
 0x75d   :  { %577 = vrot.lane.b32.xlu1 %v2205_v39, %s2332_s28 }
 0x7cb   :  { %v576_v40 = vpop.permute.xlu0 %575 }
 0x7cc   :  { %v581_v41 = vmul.f32 %v2199_v20, %v576_v40 }
 0x7ce   :  { %585 = vrot.lane.b32.xlu0 %v581_v41, %s2333_s3 }
 0x7cf   :  { %v578_v42 = vpop.permute.xlu1 %577 }
 0x7d0   :  { %v582_v43 = vmul.f32 %v2201_v14, %v578_v42 }
 0x7d2   :  { %595 = vrot.lane.b32.xlu0 %v569_v34, %s2334_s30  ;;  %587 = vrot.lane.b32.xlu1 %v582_v43, %s2333_s3 }
 0x7d6   :  { %597 = vrot.lane.b32.xlu1 %v570_v37, %s2334_s30 }
 0x840   :  { %v586_v44 = vpop.permute.xlu0 %585 }
 0x841   :  { %591 = vst.msk [vmem:[#allocation5] sm:$0xff] %vm47_vm0, %v586_v44  ;;  %604 = vst.msk [vmem:[#allocation3 + $0x10] sm:$0xff] %vm47_vm0, %v586_v44 }
 0x844   :  { %v596_v45 = vpop.permute.xlu0 %595  ;;  %v588_v46 = vpop.permute.xlu1 %587 }
 0x845   :  { %601 = vst.msk [vmem:[#allocation6] sm:$0xff] %vm47_vm0, %v596_v45  ;;  %592 = vst.msk [vmem:[#allocation5 + $0x8] sm:$0xff] %vm47_vm0, %v588_v46 }
 0x846   :  { %606 = vst.msk [vmem:[#allocation4 + $0x28] sm:$0xff] %vm47_vm0, %v588_v46 }
 0x848   :  { %v598_v47 = vpop.permute.xlu1 %597  ;;  %v611_v48 = vld [vmem:[#allocation5] sm:$0xff] }
 0x849   :  { %602 = vst.msk [vmem:[#allocation6 + $0x8] sm:$0xff] %vm47_vm0, %v598_v47 }
 0x84c   :  { %v612_v49 = vld [vmem:[#allocation5 + $0x8] sm:$0xff]  ;;  %v613_v59 = vld [vmem:[#allocation6] sm:$0xff] }
 0x84d   :  { %v615_v50 = vpack.c.bf16 %v612_v49, %v611_v48 }
 0x84f   :  { %2021 = vmatmul.mubr.msk.bf16.vlgmr.msra.gmra.mxu1 %vm47_vm0, %v615_v50 }
 0x850   :  { %2033 = vmatpush3.bf16.msra.mxu1 %v2443_v7  ;;  %2036 = vmatprep.mubr.msk.bf16.mxu1 %vm2331_vm1, %v2330_v3  ;;  %v614_v60 = vld [vmem:[#allocation6 + $0x8] sm:$0xff] }
 0x851   :  { %2034 = vmatprep.subr.bf16.mxu1 %v2330_v3 }
 0x854   :  { %2035 = vmatpush3.bf16.msra.mxu1 %v2450_v8 }
 0x855   :  { %2048 = vmatprep.subr.bf16.mxu1 %v2330_v3 }
 0x90f   :  { %v653_v51 = vpop.f32.mrf.mxu1 }
 0x910   :  { %v660_v52 = vadd.f32 %v653_v51, %v2490_v24 }
 0x911   :  { %v2022_v53 = vpop.f32.mrf.mxu1 }
 0x912   :  { %2206 = vtanh.f32 %v660_v52  ;;  %v1873_v61 = vmul.f32 -1.442695, %v660_v52 }
 0x913   :  { %v656_v54 = vpop.f32.mrf.mxu1 }
 0x914   :  { %v661_v55 = vadd.f32 %v656_v54, %v2487_v21 }
 0x915   :  { %v2023_v56 = vpop.f32.mrf.mxu1 }
 0x916   :  { %2208 = vtanh.f32 %v661_v55  ;;  %v1874_v62 = vmul.f32 -1.442695, %v661_v55 }
 0x917   :  { %2210 = vpow2.f32 %v1873_v61 }
 0x918   :  { %2212 = vpow2.f32 %v1874_v62 }
 0x91f   :  { %v2207_v57 = vpop.eup %2206 }
 0x920   :  { %688 = vrot.lane.b32.xlu0 %v2207_v57, %s2332_s28 }
 0x923   :  { %v2209_v58 = vpop.eup %2208 }
 0x924   :  { %678 = vrot.lane.b32.xlu0 %v613_v59, %s2332_s28  ;;  %690 = vrot.lane.b32.xlu1 %v2209_v58, %s2332_s28  ;;  %v2211_v63 = vpop.eup %2210 }
 0x925   :  { %v668_v0 = vadd.f32 1.0, %v2211_v63  ;;  %v2213_v1 = vpop.eup %2212 }
 0x926   :  { %v669_v2 = vadd.f32 1.0, %v2213_v1 }
 0x927   :  { %2214 = vrcp.f32 %v668_v0 }
 0x928   :  { %680 = vrot.lane.b32.xlu1 %v614_v60, %s2332_s28  ;;  %2216 = vrcp.f32 %v669_v2 }
 0x934   :  { %v2215_v4 = vpop.eup %2214 }
 0x935   :  { %v2217_v9 = vpop.eup %2216 }
 0x992   :  { %v689_v5 = vpop.permute.xlu0 %688 }
 0x993   :  { %v694_v6 = vmul.f32 %v2215_v4, %v689_v5 }
 0x995   :  { %698 = vrot.lane.b32.xlu0 %v694_v6, %s2332_s28 }
 0x996   :  { %v691_v11 = vpop.permute.xlu1 %690  ;;  %v679_v13 = vpop.permute.xlu0 %678 }
 0x997   :  { %v695_v12 = vmul.f32 %v2217_v9, %v691_v11  ;;  %v684_v15 = vmul.f32 %v2215_v4, %v679_v13 }
 0x999   :  { %700 = vrot.lane.b32.xlu1 %v695_v12, %s2332_s28 }
 0x99a   :  { %v681_v16 = vpop.permute.xlu1 %680 }
 0x99b   :  { %v685_v22 = vmul.f32 %v2217_v9, %v681_v16 }
 0xa07   :  { %v699_v19 = vpop.permute.xlu0 %698 }
 0xa08   :  { %v704_v20 = vadd.f32 %v699_v19, %v684_v15 }
 0xa0a   :  { %2218 = vtanh.f32 %v704_v20 }
 0xa0b   :  { %v701_v23 = vpop.permute.xlu1 %700 }
 0xa0c   :  { %v705_v14 = vadd.f32 %v701_v23, %v685_v22 }
 0xa0e   :  { %2220 = vtanh.f32 %v705_v14 }
 0xa17   :  { %v2219_v25 = vpop.eup %2218 }
 0xa18   :  { %710 = vrot.lane.b32.xlu0 %v2219_v25, %s2332_s28 }
 0xa1b   :  { %v2221_v28 = vpop.eup %2220 }
 0xa1c   :  { %712 = vrot.lane.b32.xlu1 %v2221_v28, %s2332_s28 }
 0xa8a   :  { %v711_v29 = vpop.permute.xlu0 %710 }
 0xa8b   :  { %v716_v30 = vmul.f32 %v2215_v4, %v711_v29 }
 0xa8d   :  { %720 = vrot.lane.b32.xlu0 %v716_v30, %s2333_s3 }
 0xa8e   :  { %v713_v32 = vpop.permute.xlu1 %712 }
 0xa8f   :  { %v717_v33 = vmul.f32 %v2217_v9, %v713_v32 }
 0xa91   :  { %730 = vrot.lane.b32.xlu0 %v704_v20, %s2334_s30  ;;  %722 = vrot.lane.b32.xlu1 %v717_v33, %s2333_s3 }
 0xa95   :  { %732 = vrot.lane.b32.xlu1 %v705_v14, %s2334_s30 }
 0xaff   :  { %v721_v34 = vpop.permute.xlu0 %720 }
 0xb00   :  { %726 = vst.msk [vmem:[#allocation5] sm:$0xff] %vm47_vm0, %v721_v34  ;;  %739 = vst.msk [vmem:[#allocation3 + $0x18] sm:$0xff] %vm47_vm0, %v721_v34 }
 0xb03   :  { %v731_v35 = vpop.permute.xlu0 %730  ;;  %v723_v36 = vpop.permute.xlu1 %722 }
 0xb04   :  { %736 = vst.msk [vmem:[#allocation6] sm:$0xff] %vm47_vm0, %v731_v35  ;;  %727 = vst.msk [vmem:[#allocation5 + $0x8] sm:$0xff] %vm47_vm0, %v723_v36 }
 0xb05   :  { %741 = vst.msk [vmem:[#allocation4 + $0x20] sm:$0xff] %vm47_vm0, %v723_v36 }
 0xb07   :  { %v733_v37 = vpop.permute.xlu1 %732  ;;  %v744_v38 = vld [vmem:[#allocation5] sm:$0xff] }
 0xb08   :  { %737 = vst.msk [vmem:[#allocation6 + $0x8] sm:$0xff] %vm47_vm0, %v733_v37 }
 0xb0b   :  { %v745_v39 = vld [vmem:[#allocation5 + $0x8] sm:$0xff]  ;;  %v746_v49 = vld [vmem:[#allocation6] sm:$0xff] }
 0xb0c   :  { %v748_v40 = vpack.c.bf16 %v745_v39, %v744_v38 }
 0xb0e   :  { %2029 = vmatmul.mubr.msk.bf16.vlgmr.msra.gmra.mxu0 %vm47_vm0, %v748_v40 }
 0xb0f   :  { %2041 = vmatpush3.bf16.msra.mxu0 %v2443_v7  ;;  %2044 = vmatprep.mubr.msk.bf16.mxu0 %vm2331_vm1, %v2330_v3  ;;  %v747_v50 = vld [vmem:[#allocation6 + $0x8] sm:$0xff] }
 0xb10   :  { %2042 = vmatprep.subr.bf16.mxu0 %v2330_v3 }
 0xb13   :  { %2043 = vmatpush3.bf16.msra.mxu0 %v2450_v8 }
 0xbce   :  { %v786_v41 = vpop.f32.mrf.mxu0 }
 0xbcf   :  { %v793_v42 = vadd.f32 %v786_v41, %v2487_v21 }
 0xbd0   :  { %v2030_v43 = vpop.f32.mrf.mxu0 }
 0xbd1   :  { %2222 = vtanh.f32 %v793_v42  ;;  %v1876_v21 = vmul.f32 -1.442695, %v793_v42 }
 0xbd2   :  { %v789_v44 = vpop.f32.mrf.mxu0 }
 0xbd3   :  { %v794_v45 = vadd.f32 %v789_v44, %v2490_v24 }
 0xbd4   :  { %v2031_v46 = vpop.f32.mrf.mxu0 }
 0xbd5   :  { %2224 = vtanh.f32 %v794_v45  ;;  %v1877_v51 = vmul.f32 -1.442695, %v794_v45 }
 0xbd6   :  { %2226 = vpow2.f32 %v1876_v21 }
 0xbd7   :  { %2228 = vpow2.f32 %v1877_v51 }
 0xbde   :  { %v2223_v47 = vpop.eup %2222 }
 0xbdf   :  { %821 = vrot.lane.b32.xlu0 %v2223_v47, %s2332_s28 }
 0xbe2   :  { %v2225_v48 = vpop.eup %2224 }
 0xbe3   :  { %811 = vrot.lane.b32.xlu0 %v746_v49, %s2332_s28  ;;  %823 = vrot.lane.b32.xlu1 %v2225_v48, %s2332_s28  ;;  %v2227_v52 = vpop.eup %2226 }
 0xbe4   :  { %v801_v24 = vadd.f32 1.0, %v2227_v52  ;;  %v2229_v53 = vpop.eup %2228 }
 0xbe5   :  { %v802_v54 = vadd.f32 1.0, %v2229_v53 }
 0xbe6   :  { %2230 = vrcp.f32 %v801_v24 }
 0xbe7   :  { %813 = vrot.lane.b32.xlu1 %v747_v50, %s2332_s28  ;;  %2232 = vrcp.f32 %v802_v54 }
 0xbf3   :  { %v2231_v55 = vpop.eup %2230 }
 0xbf4   :  { %v2233_v58 = vpop.eup %2232 }
 0xc51   :  { %v822_v56 = vpop.permute.xlu0 %821 }
 0xc52   :  { %v827_v57 = vmul.f32 %v2231_v55, %v822_v56 }
 0xc54   :  { %831 = vrot.lane.b32.xlu0 %v827_v57, %s2332_s28 }
 0xc55   :  { %v824_v59 = vpop.permute.xlu1 %823  ;;  %v812_v61 = vpop.permute.xlu0 %811 }
 0xc56   :  { %v828_v60 = vmul.f32 %v2233_v58, %v824_v59  ;;  %v817_v62 = vmul.f32 %v2231_v55, %v812_v61 }
 0xc58   :  { %833 = vrot.lane.b32.xlu1 %v828_v60, %s2332_s28 }
 0xc59   :  { %v814_v63 = vpop.permute.xlu1 %813 }
 0xc5a   :  { %v818_v2 = vmul.f32 %v2233_v58, %v814_v63 }
 0xcc6   :  { %v832_v0 = vpop.permute.xlu0 %831 }
 0xcc7   :  { %v837_v1 = vadd.f32 %v832_v0, %v817_v62 }
 0xcc9   :  { %2234 = vtanh.f32 %v837_v1 }
 0xcca   :  { %v834_v4 = vpop.permute.xlu1 %833 }
 0xccb   :  { %v838_v5 = vadd.f32 %v834_v4, %v818_v2 }
 0xccd   :  { %2236 = vtanh.f32 %v838_v5 }
 0xcd6   :  { %v2235_v6 = vpop.eup %2234 }
 0xcd7   :  { %843 = vrot.lane.b32.xlu0 %v2235_v6, %s2332_s28 }
 0xcda   :  { %v2237_v9 = vpop.eup %2236 }
 0xcdb   :  { %845 = vrot.lane.b32.xlu1 %v2237_v9, %s2332_s28 }
 0xd49   :  { %v844_v11 = vpop.permute.xlu0 %843 }
 0xd4a   :  { %v849_v12 = vmul.f32 %v2231_v55, %v844_v11 }
 0xd4c   :  { %853 = vrot.lane.b32.xlu0 %v849_v12, %s2333_s3 }
 0xd4d   :  { %v846_v13 = vpop.permute.xlu1 %845 }
 0xd4e   :  { %v850_v15 = vmul.f32 %v2233_v58, %v846_v13 }
 0xd50   :  { %863 = vrot.lane.b32.xlu0 %v837_v1, %s2334_s30  ;;  %855 = vrot.lane.b32.xlu1 %v850_v15, %s2333_s3 }
 0xd54   :  { %865 = vrot.lane.b32.xlu1 %v838_v5, %s2334_s30 }
 0xdbe   :  { %v854_v16 = vpop.permute.xlu0 %853 }
 0xdbf   :  { %859 = vst.msk [vmem:[#allocation5] sm:$0xff] %vm47_vm0, %v854_v16  ;;  %872 = vst.msk [vmem:[#allocation3 + $0x20] sm:$0xff] %vm47_vm0, %v854_v16 }
 0xdc2   :  { %v864_v19 = vpop.permute.xlu0 %863  ;;  %v856_v20 = vpop.permute.xlu1 %855 }
 0xdc3   :  { %869 = vst.msk [vmem:[#allocation6] sm:$0xff] %vm47_vm0, %v864_v19  ;;  %860 = vst.msk [vmem:[#allocation5 + $0x8] sm:$0xff] %vm47_vm0, %v856_v20 }
 0xdc4   :  { %874 = vst.msk [vmem:[#allocation4 + $0x18] sm:$0xff] %vm47_vm0, %v856_v20 }
 0xdc6   :  { %v866_v22 = vpop.permute.xlu1 %865  ;;  %v877_v23 = vld [vmem:[#allocation5] sm:$0xff] }
 0xdc7   :  { %870 = vst.msk [vmem:[#allocation6 + $0x8] sm:$0xff] %vm47_vm0, %v866_v22 }
 0xdca   :  { %v878_v14 = vld [vmem:[#allocation5 + $0x8] sm:$0xff]  ;;  %v879_v36 = vld [vmem:[#allocation6] sm:$0xff] }
 0xdcb   :  { %v881_v25 = vpack.c.bf16 %v878_v14, %v877_v23 }
 0xdcd   :  { %2037 = vmatmul.mubr.msk.bf16.vlgmr.msra.gmra.mxu1 %vm47_vm0, %v881_v25 }
 0xdce   :  { %2049 = vmatpush3.bf16.msra.mxu1 %v2443_v7  ;;  %2052 = vmatprep.mubr.msk.bf16.mxu1 %vm2331_vm1, %v2330_v3 }
 0xdcf   :  { %2050 = vmatprep.subr.bf16.mxu1 %v2330_v3 }
 0xdd2   :  { %2051 = vmatpush3.bf16.msra.mxu1 %v2450_v8  ;;  %v880_v8 = vld [vmem:[#allocation6 + $0x8] sm:$0xff] }
 0xe8d   :  { %v919_v28 = vpop.f32.mrf.mxu1 }
 0xe8e   :  { %v926_v29 = vadd.f32 %v919_v28, %v2496_v27 }
 0xe8f   :  { %v2038_v30 = vpop.f32.mrf.mxu1 }
 0xe90   :  { %2238 = vtanh.f32 %v926_v29  ;;  %v1879_v27 = vmul.f32 -1.442695, %v926_v29 }
 0xe91   :  { %v922_v32 = vpop.f32.mrf.mxu1 }
 0xe92   :  { %v927_v33 = vadd.f32 %v922_v32, %v2481_v17 }
 0xe93   :  { %v2039_v34 = vpop.f32.mrf.mxu1 }
 0xe94   :  { %2240 = vtanh.f32 %v927_v33  ;;  %v1880_v37 = vmul.f32 -1.442695, %v927_v33 }
 0xe95   :  { %2242 = vpow2.f32 %v1879_v27 }
 0xe96   :  { %2244 = vpow2.f32 %v1880_v37 }
 0xe9d   :  { %v2239_v35 = vpop.eup %2238 }
 0xe9e   :  { %954 = vrot.lane.b32.xlu0 %v2239_v35, %s2332_s28 }
 0xea1   :  { %v2241_v7 = vpop.eup %2240 }
 0xea2   :  { %944 = vrot.lane.b32.xlu0 %v879_v36, %s2332_s28  ;;  %956 = vrot.lane.b32.xlu1 %v2241_v7, %s2332_s28  ;;  %v2243_v38 = vpop.eup %2242 }
 0xea3   :  { %v934_v17 = vadd.f32 1.0, %v2243_v38  ;;  %v2245_v39 = vpop.eup %2244 }
 0xea4   :  { %v935_v40 = vadd.f32 1.0, %v2245_v39 }
 0xea5   :  { %2246 = vrcp.f32 %v934_v17 }
 0xea6   :  { %946 = vrot.lane.b32.xlu1 %v880_v8, %s2332_s28  ;;  %2248 = vrcp.f32 %v935_v40 }
 0xeb2   :  { %v2247_v41 = vpop.eup %2246 }
 0xeb3   :  { %v2249_v44 = vpop.eup %2248 }
 0xf10   :  { %v955_v42 = vpop.permute.xlu0 %954 }
 0xf11   :  { %v960_v43 = vmul.f32 %v2247_v41, %v955_v42 }
 0xf13   :  { %964 = vrot.lane.b32.xlu0 %v960_v43, %s2332_s28 }
 0xf14   :  { %v957_v45 = vpop.permute.xlu1 %956  ;;  %v945_v47 = vpop.permute.xlu0 %944 }
 0xf15   :  { %v961_v46 = vmul.f32 %v2249_v44, %v957_v45  ;;  %v950_v48 = vmul.f32 %v2247_v41, %v945_v47 }
 0xf17   :  { %966 = vrot.lane.b32.xlu1 %v961_v46, %s2332_s28 }
 0xf18   :  { %v947_v49 = vpop.permute.xlu1 %946 }
 0xf19   :  { %v951_v51 = vmul.f32 %v2249_v44, %v947_v49 }
 0xf85   :  { %v965_v50 = vpop.permute.xlu0 %964 }
 0xf86   :  { %v970_v21 = vadd.f32 %v965_v50, %v950_v48  ;;  %v1282_v48 = vld [vmem:[#allocation3 + $0x8] sm:$0xff] }
 0xf88   :  { %2250 = vtanh.f32 %v970_v21 }
 0xf89   :  { %v967_v52 = vpop.permute.xlu1 %966 }
 0xf8a   :  { %v971_v24 = vadd.f32 %v967_v52, %v951_v51  ;;  %v1281_v52 = vld [vmem:[#allocation3] sm:$0xff] }
 0xf8c   :  { %2252 = vtanh.f32 %v971_v24 }
 0xf95   :  { %v2251_v53 = vpop.eup %2250 }
 0xf96   :  { %976 = vrot.lane.b32.xlu0 %v2251_v53, %s2332_s28  ;;  %v1289_v53 = vpack.c.bf16 %v1282_v48, %v1281_v52  ;;  %v1296_v52 = vld [vmem:[#allocation4 + $0x18] sm:$0xff] }
 0xf99   :  { %v2253_v54 = vpop.eup %2252 }
 0xf9a   :  { %978 = vrot.lane.b32.xlu1 %v2253_v54, %s2332_s28 }
0x1008   :  { %v977_v55 = vpop.permute.xlu0 %976 }
0x1009   :  { %v982_v56 = vmul.f32 %v2247_v41, %v977_v55  ;;  %v2140_v41 = vld [vmem:[%s2831_s4 + $0x8] sm:$0xff]   ;;  %v1284_v55 = vld [vmem:[#allocation3 + $0x18] sm:$0xff] }
0x100a   :  { %2068 = vmatprep.subr.bf16.mxu1 %v2140_v41 }
0x100b   :  { %986 = vrot.lane.b32.xlu0 %v982_v56, %s2333_s3 }
0x100c   :  { %v979_v57 = vpop.permute.xlu1 %978 }
0x100d   :  { %v983_v58 = vmul.f32 %v2249_v44, %v979_v57  ;;  %v1283_v57 = vld [vmem:[#allocation3 + $0x10] sm:$0xff] }
0x100f   :  { %996 = vrot.lane.b32.xlu0 %v970_v21, %s2334_s30  ;;  %988 = vrot.lane.b32.xlu1 %v983_v58, %s2333_s3  ;;  %v1290_v58 = vpack.c.bf16 %v1284_v55, %v1283_v57 }
0x1013   :  { %998 = vrot.lane.b32.xlu1 %v971_v24, %s2334_s30  ;;  %v2141_v24 = vld [vmem:[%s2831_s4] sm:$0xff]  }
0x107d   :  { %v987_v59 = vpop.permute.xlu0 %986 }
0x107e   :  { %992 = vst.msk [vmem:[#allocation5] sm:$0xff] %vm47_vm0, %v987_v59  ;;  %1005 = vst.msk [vmem:[#allocation3 + $0x28] sm:$0xff] %vm47_vm0, %v987_v59  ;;  %v1285_v59 = vld [vmem:[#allocation3 + $0x20] sm:$0xff] }
0x1081   :  { %v997_v60 = vpop.permute.xlu0 %996  ;;  %v989_v61 = vpop.permute.xlu1 %988 }
0x1082   :  { %1002 = vst.msk [vmem:[#allocation6] sm:$0xff] %vm47_vm0, %v997_v60  ;;  %993 = vst.msk [vmem:[#allocation5 + $0x8] sm:$0xff] %vm47_vm0, %v989_v61 }
0x1083   :  { %1007 = vst.msk [vmem:[#allocation4 + $0x10] sm:$0xff] %vm47_vm0, %v989_v61 }
0x1085   :  { %v999_v62 = vpop.permute.xlu1 %998  ;;  %v1010_v63 = vld [vmem:[#allocation5] sm:$0xff]  ;;  %v1286_v56 = vld [vmem:[#allocation3 + $0x28] sm:$0xff] }
0x1086   :  { %1003 = vst.msk [vmem:[#allocation6 + $0x8] sm:$0xff] %vm47_vm0, %v999_v62  ;;  %v1291_v60 = vpack.c.bf16 %v1286_v56, %v1285_v59  ;;  %v1299_v59 = vld [vmem:[#allocation4 + $0x30] sm:$0xff] }
0x1089   :  { %v1011_v0 = vld [vmem:[#allocation5 + $0x8] sm:$0xff]  ;;  %v1012_v15 = vld [vmem:[#allocation6] sm:$0xff] }
0x108a   :  { %v1014_v1 = vpack.c.bf16 %v1011_v0, %v1010_v63 }
0x108c   :  { %2045 = vmatmul.mubr.msk.bf16.vlgmr.msra.gmra.mxu0 %vm47_vm0, %v1014_v1 }
0x108d   :  { %v1013_v16 = vld [vmem:[#allocation6 + $0x8] sm:$0xff] }
0x114c   :  { %v1052_v2 = vpop.f32.mrf.mxu0 }
0x114d   :  { %v1059_v4 = vadd.f32 %v1052_v2, %v2484_v18 }
0x114e   :  { %v2046_v5 = vpop.f32.mrf.mxu0 }
0x114f   :  { %2254 = vtanh.f32 %v1059_v4  ;;  %v1882_v18 = vmul.f32 -1.442695, %v1059_v4 }
0x1150   :  { %v1055_v6 = vpop.f32.mrf.mxu0 }
0x1151   :  { %v1060_v9 = vadd.f32 %v1055_v6, %v2527_v10 }
0x1152   :  { %v2047_v11 = vpop.f32.mrf.mxu0 }
0x1153   :  { %2256 = vtanh.f32 %v1060_v9  ;;  %v1883_v19 = vmul.f32 -1.442695, %v1060_v9 }
0x1154   :  { %2258 = vpow2.f32 %v1882_v18 }
0x1155   :  { %2260 = vpow2.f32 %v1883_v19 }
0x115c   :  { %v2255_v12 = vpop.eup %2254 }
0x115d   :  { %1087 = vrot.lane.b32.xlu0 %v2255_v12, %s2332_s28 }
0x1160   :  { %v2257_v13 = vpop.eup %2256 }
0x1161   :  { %1077 = vrot.lane.b32.xlu0 %v1012_v15, %s2332_s28  ;;  %1089 = vrot.lane.b32.xlu1 %v2257_v13, %s2332_s28  ;;  %v2259_v20 = vpop.eup %2258 }
0x1162   :  { %v1067_v10 = vadd.f32 1.0, %v2259_v20  ;;  %v2261_v22 = vpop.eup %2260 }
0x1163   :  { %v1068_v23 = vadd.f32 1.0, %v2261_v22 }
0x1164   :  { %2262 = vrcp.f32 %v1067_v10 }
0x1165   :  { %1079 = vrot.lane.b32.xlu1 %v1013_v16, %s2332_s28  ;;  %2264 = vrcp.f32 %v1068_v23 }
0x1171   :  { %v2263_v14 = vpop.eup %2262 }
0x1172   :  { %v2265_v29 = vpop.eup %2264 }
0x11cf   :  { %v1088_v25 = vpop.permute.xlu0 %1087 }
0x11d0   :  { %v1093_v28 = vmul.f32 %v2263_v14, %v1088_v25 }
0x11d2   :  { %1097 = vrot.lane.b32.xlu0 %v1093_v28, %s2332_s28 }
0x11d3   :  { %v1090_v30 = vpop.permute.xlu1 %1089  ;;  %v1078_v33 = vpop.permute.xlu0 %1077 }
0x11d4   :  { %v1094_v32 = vmul.f32 %v2265_v29, %v1090_v30  ;;  %v1083_v34 = vmul.f32 %v2263_v14, %v1078_v33 }
0x11d6   :  { %1099 = vrot.lane.b32.xlu1 %v1094_v32, %s2332_s28 }
0x11d7   :  { %v1080_v35 = vpop.permute.xlu1 %1079 }
0x11d8   :  { %v1084_v8 = vmul.f32 %v2265_v29, %v1080_v35  ;;  %v2143_v35 = vld [vmem:[%s2832_s5] sm:$0xff]  }
0x1244   :  { %v1098_v7 = vpop.permute.xlu0 %1097 }
0x1245   :  { %v1103_v36 = vadd.f32 %v1098_v7, %v1083_v34  ;;  %v2142_v34 = vld [vmem:[%s2832_s5 + $0x8] sm:$0xff]   ;;  %s1826_s5 = sshll.u32 %s2335_s22, 4  ;;  %s1827_s5 = int_to_ptr.vmem [resolvable:$true] %s1826_s5 }
0x1246   :  { %2056 = vmatprep.subr.bf16.mxu0 %v2142_v34  ;;  %p2291_p1 = scmp.lt.s32.totalorder %s1827_s5, %s1827_s5 }
0x1247   :  { %2266 = vtanh.f32 %v1103_v36  ;;  %2057 = vmatpush3.bf16.msra.mxu0 %v2142_v34 }
0x1248   :  { %v1100_v27 = vpop.permute.xlu1 %1099  ;;  %2058 = vmatprep.subr.bf16.mxu0 %v2143_v35 }
0x1249   :  { %v1104_v37 = vadd.f32 %v1100_v27, %v1084_v8 }
0x124b   :  { %2268 = vtanh.f32 %v1104_v37  ;;  %2059 = vmatpush3.bf16.msra.mxu0 %v2143_v35 }
0x1254   :  { %v2267_v38 = vpop.eup %2266 }
0x1255   :  { %1109 = vrot.lane.b32.xlu0 %v2267_v38, %s2332_s28 }
0x1258   :  { %v2269_v17 = vpop.eup %2268 }
0x1259   :  { %1111 = vrot.lane.b32.xlu1 %v2269_v17, %s2332_s28 }
0x12c7   :  { %v1110_v39 = vpop.permute.xlu0 %1109 }
0x12c8   :  { %v1115_v40 = vmul.f32 %v2263_v14, %v1110_v39  ;;  %v2150_v39 = vld [vmem:[%s2835_s8 + $0x18] sm:$0xff]  }
0x12ca   :  { %1119 = vrot.lane.b32.xlu0 %v1115_v40, %s2333_s3  ;;  %v2152_v40 = vld [vmem:[%s2835_s8 + $0x10] sm:$0xff]  }
0x12cb   :  { %v1112_v42 = vpop.permute.xlu1 %1111 }
0x12cc   :  { %v1116_v43 = vmul.f32 %v2265_v29, %v1112_v42  ;;  %v2156_v42 = vld [vmem:[%s2835_s8] sm:$0xff]  }
0x12ce   :  { %1131 = vrot.lane.b32.xlu0 %v1104_v37, %s2334_s30  ;;  %1121 = vrot.lane.b32.xlu1 %v1116_v43, %s2333_s3  ;;  %v2144_v37 = vld [vmem:[%s2833_s6 + $0x8] sm:$0xff]  }
0x12cf   :  { %2080 = vmatprep.subr.bf16.mxu0 %v2144_v37 }
0x12d2   :  { %1129 = vrot.lane.b32.xlu0 %v1103_v36, %s2334_s30 }
0x133c   :  { %v1120_v44 = vpop.permute.xlu0 %1119 }
0x133d   :  { %1125 = vst.msk [vmem:[#allocation5] sm:$0xff] %vm47_vm0, %v1120_v44  ;;  %1138 = vst.msk [vmem:[#allocation3 + $0x30] sm:$0xff] %vm47_vm0, %v1120_v44 }
0x1340   :  { %v1132_v45 = vpop.permute.xlu0 %1131  ;;  %v1122_v46 = vpop.permute.xlu1 %1121 }
0x1341   :  { %1136 = vst.msk [vmem:[#allocation6 + $0x8] sm:$0xff] %vm47_vm0, %v1132_v45  ;;  %1126 = vst.msk [vmem:[#allocation5 + $0x8] sm:$0xff] %vm47_vm0, %v1122_v46 }
0x1342   :  { %1140 = vst.msk [vmem:[#allocation4 + $0x8] sm:$0xff] %vm47_vm0, %v1122_v46  ;;  %v1295_v46 = vld [vmem:[#allocation4 + $0x10] sm:$0xff] }
0x1344   :  { %v1130_v47 = vpop.permute.xlu0 %1129  ;;  %v1143_v50 = vld [vmem:[#allocation5] sm:$0xff]  ;;  %v1287_v56 = vld [vmem:[#allocation3 + $0x30] sm:$0xff] }
0x1345   :  { %1135 = vst.msk [vmem:[#allocation6] sm:$0xff] %vm47_vm0, %v1130_v47  ;;  %v1297_v47 = vld [vmem:[#allocation4 + $0x20] sm:$0xff] }
0x1348   :  { %v1146_v49 = vld [vmem:[#allocation6 + $0x8] sm:$0xff]  ;;  %v1144_v21 = vld [vmem:[#allocation5 + $0x8] sm:$0xff] }
0x1349   :  { %1212 = vrot.lane.b32.xlu0 %v1146_v49, %s2332_s28  ;;  %v1147_v51 = vpack.c.bf16 %v1144_v21, %v1143_v50  ;;  %v1294_v45 = vld [vmem:[#allocation4 + $0x8] sm:$0xff] }
0x134b   :  { %2053 = vmatmul.mubr.msk.bf16.vlgmr.msra.gmra.mxu1 %vm47_vm0, %v1147_v51 }
0x134c   :  { %2069 = vmatpush3.bf16.msra.mxu1 %v2140_v41  ;;  %2072 = vmatprep.mubr.msk.bf16.mxu1 %vm47_vm0, %v1289_v53  ;;  %v1145_v54 = vld [vmem:[#allocation6] sm:$0xff]  ;;  %v2154_v41 = vld [vmem:[%s2835_s8 + $0x8] sm:$0xff]  }
0x134d   :  { %1210 = vrot.lane.b32.xlu0 %v1145_v54, %s2332_s28  ;;  %2070 = vmatprep.subr.bf16.mxu1 %v2141_v24  ;;  %v1298_v53 = vld [vmem:[#allocation4 + $0x28] sm:$0xff]  ;;  %v2145_v54 = vld [vmem:[%s2833_s6] sm:$0xff]  }
0x134e   :  { %v1303_v55 = vpack.c.bf16 %v1298_v53, %v1297_v47 }
0x1350   :  { %2071 = vmatpush3.bf16.msra.mxu1 %v2141_v24  ;;  %v1302_v24 = vpack.c.bf16 %v1296_v52, %v1295_v46 }
0x1351   :  { %2092 = vmatprep.subr.bf16.mxu1 %v2330_v3 }
0x1353   :  { %2073 = vmatmul.mubr.msk.bf16.vlgmr.msra.gmra.mxu1 %vm47_vm0, %v1290_v58 }
0x1354   :  { %2076 = vmatprep.mubr.msk.bf16.mxu1 %vm47_vm0, %v1291_v60  ;;  %2093 = vmatpush3.bf16.msra.mxu1 %v2150_v39  ;;  %v1300_v60 = vld [vmem:[#allocation4 + $0x38] sm:$0xff] }
0x1355   :  { %2094 = vmatprep.subr.bf16.mxu1 %v2330_v3 }
0x1358   :  { %2095 = vmatpush3.bf16.msra.mxu1 %v2152_v40 }
0x1359   :  { %2096 = vmatprep.subr.bf16.mxu1 %v2330_v3 }
0x135c   :  { %2097 = vmatpush3.bf16.msra.mxu1 %v2154_v41 }
0x135d   :  { %2098 = vmatprep.subr.bf16.mxu1 %v2330_v3 }
0x1360   :  { %2099 = vmatpush3.bf16.msra.mxu1 %v2156_v42 }
0x13bb   :  { %v1213_v10 = vpop.permute.xlu0 %1212 }
0x13bf   :  { %v1211_v25 = vpop.permute.xlu0 %1210 }
0x140b   :  { %v1185_v61 = vpop.f32.mrf.mxu1 }
0x140c   :  { %v1192_v2 = vadd.f32 %v1185_v61, %v2500_v31  ;;  %v2146_v61 = vld [vmem:[%s2827_s0] sm:$0xff]  }
0x140d   :  { %v2054_v62 = vpop.f32.mrf.mxu1 }
0x140e   :  { %v1885_v9 = vmul.f32 -1.442695, %v1192_v2  ;;  %v1304_v62 = vpack.c.bf16 %v1300_v60, %v1299_v59 }
0x140f   :  { %v1188_v63 = vpop.f32.mrf.mxu1 }
0x1410   :  { %v1193_v0 = vadd.f32 %v1188_v63, %v2493_v26  ;;  %v2147_v63 = vld [vmem:[%s2827_s0 + $0x8] sm:$0xff]  }
0x1411   :  { %v2055_v1 = vpop.f32.mrf.mxu1 }
0x1412   :  { %2270 = vtanh.f32 %v1193_v0  ;;  %v1886_v6 = vmul.f32 -1.442695, %v1193_v0  ;;  %v2148_v0 = vld [vmem:[%s2827_s0 + $0x10] sm:$0xff]   ;;  %v2151_v1 = vld [vmem:[%s2836_s9 + $0x18] sm:$0xff]  }
0x1413   :  { %2272 = vtanh.f32 %v1192_v2  ;;  %v2153_v2 = vld [vmem:[%s2836_s9 + $0x10] sm:$0xff]  }
0x1414   :  { %2274 = vpow2.f32 %v1886_v6  ;;  %v2157_v6 = vld [vmem:[%s2836_s9] sm:$0xff]  }
0x1415   :  { %2276 = vpow2.f32 %v1885_v9 }
0x141f   :  { %v2271_v4 = vpop.eup %2270 }
0x1420   :  { %1222 = vrot.lane.b32.xlu1 %v2271_v4, %s2332_s28  ;;  %v2273_v5 = vpop.eup %2272  ;;  %v2149_v4 = vld [vmem:[%s2827_s0 + $0x18] sm:$0xff]  }
0x1421   :  { %v2275_v11 = vpop.eup %2274 }
0x1422   :  { %v1201_v12 = vadd.f32 1.0, %v2275_v11  ;;  %v2277_v13 = vpop.eup %2276 }
0x1423   :  { %v1200_v15 = vadd.f32 1.0, %v2277_v13 }
0x1424   :  { %1220 = vrot.lane.b32.xlu1 %v2273_v5, %s2332_s28  ;;  %2278 = vrcp.f32 %v1201_v12  ;;  %v2155_v5 = vld [vmem:[%s2836_s9 + $0x8] sm:$0xff]  }
0x1425   :  { %2280 = vrcp.f32 %v1200_v15 }
0x1431   :  { %v2279_v26 = vpop.eup %2278 }
0x1432   :  { %v2281_v18 = vpop.eup %2280  ;;  %v1217_v22 = vmul.f32 %v2279_v26, %v1213_v10 }
0x1433   :  { %v1216_v28 = vmul.f32 %v2281_v18, %v1211_v25 }
0x1492   :  { %v1223_v31 = vpop.permute.xlu1 %1222 }
0x1493   :  { %v1227_v16 = vmul.f32 %v2279_v26, %v1223_v31 }
0x1495   :  { %1232 = vrot.lane.b32.xlu1 %v1227_v16, %s2332_s28 }
0x1496   :  { %v1221_v19 = vpop.permute.xlu1 %1220 }
0x1497   :  { %v1226_v20 = vmul.f32 %v2281_v18, %v1221_v19 }
0x1499   :  { %1230 = vrot.lane.b32.xlu1 %v1226_v20, %s2332_s28  ;;  %v2074_v20 = vpop.f32.mrf.mxu1 }
0x1507   :  { %v1233_v23 = vpop.permute.xlu1 %1232 }
0x1508   :  { %v1237_v14 = vadd.f32 %v1233_v23, %v1217_v22 }
0x150a   :  { %2282 = vtanh.f32 %v1237_v14 }
0x150b   :  { %v1231_v29 = vpop.permute.xlu1 %1230 }
0x150c   :  { %v1236_v30 = vadd.f32 %v1231_v29, %v1216_v28 }
0x150e   :  { %2284 = vtanh.f32 %v1236_v30 }
0x1517   :  { %v2283_v32 = vpop.eup %2282 }
0x1518   :  { %1244 = vrot.lane.b32.xlu0 %v2283_v32, %s2332_s28 }
0x151b   :  { %v2285_v33 = vpop.eup %2284 }
0x151c   :  { %1242 = vrot.lane.b32.xlu1 %v2285_v33, %s2332_s28 }
0x1520   :  { %1264 = vrot.lane.b32.xlu1 %v1237_v14, %s2334_s30 }
0x1524   :  { %1262 = vrot.lane.b32.xlu1 %v1236_v30, %s2334_s30 }
0x158a   :  { %v1245_v7 = vpop.permute.xlu0 %1244 }
0x158b   :  { %v1249_v36 = vmul.f32 %v2279_v26, %v1245_v7  ;;  %v1909_v7 = vld [vmem:[%s2834_s7] ss:$0 sm:$0xff] }
0x158d   :  { %1254 = vrot.lane.b32.xlu0 %v1249_v36, %s2333_s3 }
0x158e   :  { %v1243_v8 = vpop.permute.xlu1 %1242 }
0x158f   :  { %v1248_v27 = vmul.f32 %v2281_v18, %v1243_v8 }
0x1591   :  { %1252 = vrot.lane.b32.xlu0 %v1248_v27, %s2333_s3 }
0x1592   :  { %v1265_v38 = vpop.permute.xlu1 %1264 }
0x1593   :  { %1269 = vst.msk [vmem:[#allocation6 + $0x8] sm:$0xff] %vm47_vm0, %v1265_v38 }
0x1596   :  { %v1263_v17 = vpop.permute.xlu1 %1262 }
0x1597   :  { %1268 = vst.msk [vmem:[#allocation6] sm:$0xff] %vm47_vm0, %v1263_v17 }
0x159a   :  { %v1654_v50 = vld [vmem:[#allocation6 + $0x8] sm:$0xff] }
0x159e   :  { %v1653_v15 = vld [vmem:[#allocation6] sm:$0xff] }
0x15ff   :  { %v1255_v43 = vpop.permute.xlu0 %1254 }
0x1600   :  { %1259 = vst.msk [vmem:[#allocation5 + $0x8] sm:$0xff] %vm47_vm0, %v1255_v43  ;;  %1272 = vst.msk [vmem:[#allocation4] sm:$0xff] %vm47_vm0, %v1255_v43 }
0x1603   :  { %v1253_v44 = vpop.permute.xlu0 %1252 }
0x1604   :  { %1258 = vst.msk [vmem:[#allocation5] sm:$0xff] %vm47_vm0, %v1253_v44  ;;  %1271 = vst.msk [vmem:[#allocation3 + $0x38] sm:$0xff] %vm47_vm0, %v1253_v44 }
0x1607   :  { %v1293_v48 = vld [vmem:[#allocation4] sm:$0xff]  ;;  %v1652_v49 = vld [vmem:[#allocation5 + $0x8] sm:$0xff] }
0x1608   :  { %v1301_v21 = vpack.c.bf16 %v1294_v45, %v1293_v48  ;;  %v2127_v51 = vpack.i.bf16 %v1654_v50, %v1652_v49 }
0x160a   :  { %2060 = vmatprep.mubr.msk.bf16.mxu0 %vm47_vm0, %v1301_v21  ;;  %2128 = vrot.lane.b32.xlu0 %v2127_v51, %s2332_s28 }
0x160b   :  { %2061 = vmatmul.mubr.msk.bf16.vlgmr.msra.gmra.mxu0 %vm47_vm0, %v1302_v24  ;;  %v1288_v57 = vld [vmem:[#allocation3 + $0x38] sm:$0xff]  ;;  %v1651_v13 = vld [vmem:[#allocation5] sm:$0xff] }
0x160c   :  { %2064 = vmatprep.mubr.msk.bf16.mxu0 %vm47_vm0, %v1303_v55  ;;  %v1292_v58 = vpack.c.bf16 %v1288_v57, %v1287_v56  ;;  %2081 = vmatpush3.bf16.msra.mxu0 %v2144_v37 }
0x160d   :  { %2082 = vmatprep.subr.bf16.mxu0 %v2145_v54 }
0x160e   :  { %2077 = vmatmul.mubr.msk.bf16.gmra.mxu1 %vm47_vm0, %v1292_v58 }
0x160f   :  { %2100 = vmatprep.mubr.msk.bf16.mxu1 %vm2331_vm1, %v2330_v3 }
0x1610   :  { %2083 = vmatpush3.bf16.msra.mxu0 %v2145_v54 }
0x1611   :  { %2104 = vmatprep.subr.bf16.mxu0 %v2330_v3 }
0x1613   :  { %2065 = vmatmul.mubr.msk.bf16.gmra.mxu0 %vm47_vm0, %v1304_v62 }
0x1614   :  { %2084 = vmatprep.mubr.msk.bf16.mxu0 %vm47_vm0, %v2146_v61 }
0x161b   :  { %2085 = vmatmul.mubr.msk.bf16.vlgmr.msra.gmra.mxu0 %vm47_vm0, %v2147_v63 }
0x161c   :  { %2088 = vmatprep.mubr.msk.bf16.mxu0 %vm47_vm0, %v2148_v0  ;;  %2105 = vmatpush3.bf16.msra.mxu0 %v2151_v1  ;;  %v1910_v0 = vld [vmem:[%s2837_s10] ss:$0 sm:$0xff]  ;;  %s2286_s10 = scalar_lea.vmem %s1827_s5, 128 }
0x161d   :  { %2106 = vmatprep.subr.bf16.mxu0 %v2330_v3  ;;  %v1916_v1 = vld [vmem:[%s2838_s11] ss:$0 sm:$0xff]  ;;  %p2287_p0 = scmp.ne.s32.totalorder %s1827_s5, %s2286_s10  ;;  %p2292_p2 = scmp.lt.s32.totalorder %s2286_s10, %s2286_s10 }
0x161f   :  { %p2293_p3 = por %p2292_p2, %p2291_p1 }
0x1620   :  { %2107 = vmatpush3.bf16.msra.mxu0 %v2153_v2 }
0x1621   :  { %2108 = vmatprep.subr.bf16.mxu0 %v2330_v3  ;;  %p2294_p4 = pnand %p2293_p3, %p2287_p0 }
0x1623   :  { %2089 = vmatmul.mubr.msk.bf16.gmra.mxu0 %vm47_vm0, %v2149_v4 }
0x1624   :  { %2109 = vmatpush3.bf16.msra.mxu0 %v2155_v5  ;;  %2112 = vmatprep.mubr.msk.bf16.mxu0 %vm2331_vm1, %v2330_v3 }
0x1625   :  { %2110 = vmatprep.subr.bf16.mxu0 %v2330_v3  ;;  %v1452_v3 = vpop.f32.mrf.mxu1 }
0x1627   :  { %v2075_v25 = vpop.f32.mrf.mxu1 }
0x1628   :  { %2111 = vmatpush3.bf16.msra.mxu0 %v2157_v6 }
0x1629   :  { %v1455_v30 = vpop.f32.mrf.mxu1 }
0x167c   :  { %v2129_v9 = vpop.permute.xlu0 %2128 }
0x167d   :  { %v2131_v11 = vunpack.i.h.bf16 %v2129_v9  ;;  %v2130_v12 = vunpack.i.l.bf16 %v2129_v9 }
0x167f   :  { %v1665_v26 = vsel %vm47_vm0, %v1653_v15, %v2131_v11  ;;  %v1659_v31 = vsel %vm47_vm0, %v1651_v13, %v2130_v12 }
0x1680   :  { %v1666_v16 = vpack.c.bf16 %v1665_v26, %v1665_v26  ;;  %v1660_v18 = vpack.c.bf16 %v1659_v31, %v1659_v31 }
0x1682   :  { %2101 = vmatmul.mubr.msk.bf16.vlgmr.msra.gmra.mxu1 %vm1698_vm2, %v1660_v18  ;;  %2113 = vmatmul.mubr.msk.bf16.vlgmr.msra.gmra.mxu0 %vm1698_vm2, %v1666_v16 }
0x16cb   :  { %v2062_v19 = vpop.f32.mrf.mxu0 }
0x16cc   :  { %v1461_v33 = vadd.f32 %v2074_v20, %v2062_v19 }
0x16cd   :  { %v1363_v10 = vpop.f32.mrf.mxu0 }
0x16ce   :  { %v2078_v34 = vpop.f32.mrf.mxu1  ;;  %v1453_v36 = vadd.f32 %v1452_v3, %v1363_v10 }
0x16cf   :  { %v2063_v22 = vpop.f32.mrf.mxu0 }
0x16d0   :  { %v1464_v37 = vadd.f32 %v2075_v25, %v2063_v22  ;;  %v1468_v39 = vpop.f32.mrf.mxu1 }
0x16d1   :  { %v1366_v23 = vpop.f32.mrf.mxu0 }
0x16d2   :  { %v1456_v41 = vadd.f32 %v1455_v30, %v1366_v23  ;;  %v2079_v48 = vpop.f32.mrf.mxu1 }
0x16d3   :  { %v2066_v14 = vpop.f32.mrf.mxu0 }
0x16d4   :  { %v1477_v45 = vadd.f32 %v2078_v34, %v2066_v14  ;;  %v1471_v55 = vpop.f32.mrf.mxu1 }
0x16d5   :  { %v1379_v28 = vpop.f32.mrf.mxu0 }
0x16d6   :  { %v1469_v50 = vadd.f32 %v1468_v39, %v1379_v28 }
0x16d7   :  { %v2067_v29 = vpop.f32.mrf.mxu0 }
0x16d8   :  { %v1480_v24 = vadd.f32 %v2079_v48, %v2067_v29 }
0x16d9   :  { %v1382_v32 = vpop.f32.mrf.mxu0 }
0x16da   :  { %v1472_v57 = vadd.f32 %v1471_v55, %v1382_v32 }
0x16db   :  { %v2086_v35 = vpop.f32.mrf.mxu0 }
0x16dc   :  { %v1606_v8 = vadd.f32 %v2086_v35, %v1461_v33 }
0x16dd   :  { %v1573_v27 = vpop.f32.mrf.mxu0 }
0x16de   :  { %v1621_v38 = vadd.f32 %v1909_v7, %v1606_v8  ;;  %v1604_v17 = vadd.f32 %v1573_v27, %v1453_v36 }
0x16df   :  { %v2087_v40 = vpop.f32.mrf.mxu0 }
0x16e0   :  { %1629 = vst.msk [vmem:[%s2839_s12 + $0x10] sm:$0xff] %vm47_vm0, %v1621_v38  ;;  %v1619_v42 = vadd.f32 %v1909_v7, %v1604_v17  ;;  %v1607_v43 = vadd.f32 %v2087_v40, %v1464_v37 }
0x16e1   :  { %v1576_v44 = vpop.f32.mrf.mxu0 }
0x16e2   :  { %1627 = vst.msk [vmem:[%s2839_s12] sm:$0xff] %vm47_vm0, %v1619_v42  ;;  %v1622_v46 = vadd.f32 %v1909_v7, %v1607_v43  ;;  %v1605_v47 = vadd.f32 %v1576_v44, %v1456_v41 }
0x16e3   :  { %v2090_v49 = vpop.f32.mrf.mxu0 }
0x16e4   :  { %1630 = vst.msk [vmem:[%s2839_s12 + $0x18] sm:$0xff] %vm47_vm0, %v1622_v46  ;;  %v1620_v21 = vadd.f32 %v1909_v7, %v1605_v47  ;;  %v1610_v51 = vadd.f32 %v2090_v49, %v1477_v45 }
0x16e5   :  { %v1589_v52 = vpop.f32.mrf.mxu0 }
0x16e6   :  { %1628 = vst.msk [vmem:[%s2839_s12 + $0x8] sm:$0xff] %vm47_vm0, %v1620_v21  ;;  %v1625_v53 = vadd.f32 %v1909_v7, %v1610_v51  ;;  %v1608_v54 = vadd.f32 %v1589_v52, %v1469_v50 }
0x16e7   :  { %v2091_v56 = vpop.f32.mrf.mxu0 }
0x16e8   :  { %1633 = vst.msk [vmem:[%s2839_s12 + $0x30] sm:$0xff] %vm47_vm0, %v1625_v53  ;;  %v1623_v58 = vadd.f32 %v1909_v7, %v1608_v54  ;;  %v1611_v59 = vadd.f32 %v2091_v56, %v1480_v24 }
0x16e9   :  { %v1592_v60 = vpop.f32.mrf.mxu0 }
0x16ea   :  { %1631 = vst.msk [vmem:[%s2839_s12 + $0x20] sm:$0xff] %vm47_vm0, %v1623_v58  ;;  %v1626_v61 = vadd.f32 %v1909_v7, %v1611_v59  ;;  %v1609_v62 = vadd.f32 %v1592_v60, %v1472_v57 }
0x16ec   :  { %1634 = vst.msk [vmem:[%s2839_s12 + $0x38] sm:$0xff] %vm47_vm0, %v1626_v61  ;;  %v1624_v63 = vadd.f32 %v1909_v7, %v1609_v62 }
0x16ee   :  { %1632 = vst.msk [vmem:[%s2839_s12 + $0x28] sm:$0xff] %vm47_vm0, %v1624_v63 }
0x1742   :  { %v1736_v2 = vpop.f32.mrf.mxu1  ;;  %v1811_v4 = vpop.f32.mrf.mxu0 }
0x1743   :  { %v1737_v5 = vadd.f32 %v1910_v0, %v1736_v2  ;;  %v1812_v6 = vadd.f32 %v1916_v1, %v1811_v4 }
0x1744   :  { %v2102_v9 = vpop.f32.mrf.mxu1  ;;  %v2114_v11 = vpop.f32.mrf.mxu0 }
0x1745   :  { %1742 = vst.msk [vmem:[#allocation7] sm:$0xff] %vm47_vm0, %v1737_v5  ;;  %1817 = vst.msk [vmem:[#allocation9] sm:$0xff] %vm47_vm0, %v1812_v6 }
0x1746   :  { %v1739_v12 = vpop.f32.mrf.mxu1  ;;  %v1814_v13 = vpop.f32.mrf.mxu0 }
0x1747   :  { %2297 = shalt.err (!%p2294_p4)
}
0x1748   :  { %1829 = dma.vmem_to_hbm [thread:$0]  %s1827_s5, 128, %s2840_s13, [#allocation8]  }
0x1749   :  { %s2306_s0 = scalar_lea.vmem %s1837_s24, 128  ;;  %p2311_p6 = scmp.lt.s32.totalorder %s1837_s24, %s1837_s24 }
0x174a   :  { %p2307_p5 = scmp.ne.s32.totalorder %s1837_s24, %s2306_s0  ;;  %p2312_p7 = scmp.lt.s32.totalorder %s2306_s0, %s2306_s0 }
0x174c   :  { %p2313_p8 = por %p2312_p7, %p2311_p6 }
0x174e   :  { %p2314_p9 = pnand %p2313_p8, %p2307_p5 }
0x1750   :  { %2317 = shalt.err (!%p2314_p9)
}
0x1751   :  { %1839 = dma.vmem_to_hbm [thread:$0]  %s1837_s24, 128, %s2841_s14, [#allocation10]   ;;  %v2103_v15 = vpop.f32.mrf.mxu1  ;;  %v2115_v26 = vpop.f32.mrf.mxu0 }
0x1752   :  { %2326 = dma.done.wait [#allocation8], 128  }
0x1753   :  { %2327 = vsyncadd [#allocation8], 4294967168 }
0x1754   :  { %2328 = dma.done.wait [#allocation10], 128  }
0x1755   :  { %2329 = vsyncadd [#allocation10], 4294967168 }
0x1756   :  { %1848 = vsyncpa [#allocation8], 1 }
0x1757   :  { %1849 = vsyncpa [#allocation10], 1 }

</bundles_post_ra>
